<compile_context>
chip_gen: v5e
topology: v5e:2x2
jax: 0.10.0
libtpu: 0.0.40
codegen_flags: <defaults>
</compile_context>

<pallas_src>
import math

import jax
import jax.numpy as jnp
from jax import lax
from jax.experimental import pallas as pl
from jax.experimental.pallas import tpu as pltpu

EPS = 1e-6

# Scoped-VMEM request: 48 MiB fits every generation (v7x has only 64 MiB
# physical per TensorCore; v5e/v6e have 128 MiB physical but 16/32 MiB default
# scoped limits that are too small for multi-MB tiles, so raise explicitly).
_VMEM_LIMIT_BYTES = 48 * 1024 * 1024
# Working budget used to size tiles (headroom under the limit for the resident
# constants and Mosaic-internal scratch).
_VMEM_TILE_BUDGET_BYTES = 32 * 1024 * 1024
# Hard cap on packed tile rows: 2048 packed rows = 16384 batch rows
# ~ 5.2 MB of real HBM bytes per grid step (>= the ~4 MB amortization target).
_MAX_TILE_ROWS = 2048


def _rows_per_pack(d, o):
    """Smallest R with R*d % 128 == 0 and R*o % 128 == 0 (lane-dense packing
    with a 1:1 correspondence between packed input rows and packed output rows)."""
    r_in = 128 // math.gcd(d, 128)
    r_out = 128 // math.gcd(o, 128)
    return r_in * r_out // math.gcd(r_in, r_out)


def _choose_tile_rows(rows, lanes_in, lanes_out):
    """Packed-row tile size from corrected VMEM accounting.

    All blocks are lane-dense f32, so the footprint per packed row is exactly:
      * 2 input streams, double-buffered  : 2 * 2 * lanes_in * 4
      * 1 output stream, double-buffered  : 2 * lanes_out * 4
      * in-kernel f32 temporaries         : ~2 live (tile, lanes_in) MXU
        operands + ~5 (tile, lanes_out) intermediates (dot/n1/n2/inv/cos).
    """
    if rows <= 8:
        return rows                                   # single full-extent block
    itm = 4                                           # everything is f32 in VMEM
    stream_bytes = 2 * (2 * lanes_in * itm) + 2 * (lanes_out * itm)
    temp_bytes = 2 * lanes_in * itm + 5 * lanes_out * itm
    tbp = int(_VMEM_TILE_BUDGET_BYTES // (stream_bytes + temp_bytes))
    tbp = min(tbp, _MAX_TILE_ROWS)
    # Give megacore (v7x) at least two grid steps to split across TensorCores;
    # a no-op for large batches where the cap above binds.
    half = -(-rows // 2)
    half = -(-half // 8) * 8
    tbp = min(tbp, max(8, half))
    tbp = max(8, (tbp // 8) * 8)                      # f32 sublane multiple
    return min(tbp, -(-rows // 8) * 8)


def _classifier_kernel(m1_ref, m2_ref, seg_ref, wb_ref, o_ref):
    # m1/m2 blocks: (TBP, R*D) lane-dense packed rows (R batch rows per row).
    x1 = m1_ref[...].astype(jnp.float32)
    x2 = m2_ref[...].astype(jnp.float32)
    seg = seg_ref[...]                                # (R*D, R*O) 0/1 segment matrix

    # Per-batch-row reductions over the D-lane segments, done on the otherwise
    # idle MXU.  seg[k, l] = 1 iff k//D == l//O, so each result lane l already
    # holds the reduction of batch row (R*r + l//O) replicated O times along
    # lanes -> the whole kernel stays lane-dense with no shuffles/reshapes.
    hi = lax.Precision.HIGHEST                        # keep f32-level accuracy
    dot = jnp.dot(x1 * x2, seg, preferred_element_type=jnp.float32, precision=hi)
    n1sq = jnp.dot(x1 * x1, seg, preferred_element_type=jnp.float32, precision=hi)
    n2sq = jnp.dot(x2 * x2, seg, preferred_element_type=jnp.float32, precision=hi)

    # cos = <x1,x2> * rsqrt(max(|x1|^2 * |x2|^2, eps^2))   (single EUP op;
    # identical to ATen's clamp of the product of squared norms).
    cos = dot * lax.rsqrt(jnp.maximum(n1sq * n2sq, EPS * EPS))   # (TBP, R*O)

    # Linear(1 -> O) as a lane-dense VPU broadcast multiply-add.
    # wb row 0 = weight tiled R times, row 1 = bias tiled R times.
    o_ref[...] = (cos * wb_ref[0:1, :] + wb_ref[1:2, :]).astype(o_ref.dtype)


def classifier_forward(meas1, meas2, weight, bias, *, tile_rows=None):
    """meas1, meas2: (B, D); weight: (O, 1) PyTorch layout (or (O,)); bias: (O,)."""
    B, D = meas1.shape
    O = weight.shape[0]

    R = _rows_per_pack(D, O)                          # batch rows per packed row
    lanes_in, lanes_out = R * D, R * O

    # Pad the batch to a multiple of R.  Zero rows are harmless: norms clamp to
    # eps^2, cos = 0, and the rows are sliced off at the end.
    B_pad = -(-B // R) * R
    if B_pad != B:
        pad = ((0, B_pad - B), (0, 0))
        meas1 = jnp.pad(meas1, pad)
        meas2 = jnp.pad(meas2, pad)
    rows = B_pad // R

    # Free, row-contiguous lane-packing reshapes (no data movement).
    m1p = meas1.reshape(rows, lanes_in)
    m2p = meas2.reshape(rows, lanes_in)

    # Resident constants (constant index_map -> DMA'd once, not per grid step).
    kk = jnp.arange(lanes_in) // D
    ll = jnp.arange(lanes_out) // O
    seg = (kk[:, None] == ll[None, :]).astype(jnp.float32)          # (R*D, R*O)
    w_flat = weight.reshape(-1).astype(jnp.float32)
    b_flat = bias.reshape(-1).astype(jnp.float32)
    wb = jnp.stack([jnp.tile(w_flat, R), jnp.tile(b_flat, R)])       # (2, R*O)

    TBP = tile_rows if tile_rows is not None else _choose_tile_rows(
        rows, lanes_in, lanes_out)
    grid = (pl.cdiv(rows, TBP),)

    out_packed = pl.pallas_call(
        _classifier_kernel,
        out_shape=jax.ShapeDtypeStruct((rows, lanes_out), jnp.float32),
        grid_spec=pltpu.PrefetchScalarGridSpec(
            num_scalar_prefetch=0,
            grid=grid,
            in_specs=[
                pl.BlockSpec((TBP, lanes_in), lambda i: (i, 0)),
                pl.BlockSpec((TBP, lanes_in), lambda i: (i, 0)),
                pl.BlockSpec((lanes_in, lanes_out), lambda i: (0, 0)),  # resident
                pl.BlockSpec((2, lanes_out), lambda i: (0, 0)),         # resident
            ],
            out_specs=pl.BlockSpec((TBP, lanes_out), lambda i: (i, 0)),
        ),
        compiler_params=pltpu.CompilerParams(
            # Independent batch tiles -> shard across both v7x TensorCores.
            dimension_semantics=("parallel",),
            vmem_limit_bytes=_VMEM_LIMIT_BYTES,
        ),
    )(m1p, m2p, seg, wb)

    # Free unpacking reshape + slice back to (B, O).
    return out_packed.reshape(B_pad, O)[:B]


def reference_forward(meas1, meas2, weight, bias):
    """Pure-JAX reference matching PyTorch semantics."""
    x1 = meas1.astype(jnp.float32)
    x2 = meas2.astype(jnp.float32)
    dot = jnp.sum(x1 * x2, axis=1)
    n1 = jnp.sqrt(jnp.sum(x1 * x1, axis=1))
    n2 = jnp.sqrt(jnp.sum(x2 * x2, axis=1))
    cos = dot / jnp.maximum(n1 * n2, EPS)             # (B,)
    dist = cos.reshape(-1, 1)                         # (B, 1)
    return dist @ weight.reshape(-1, 1).T + bias.reshape(-1)   # (B, O)


if __name__ == "__main__":
    # Shapes consistent with the module: batch = BATCH_SIZE = 200,
    # measurement dim D, Linear(1, output_size).
    B = 200
    D = 32
    OUTPUT_SIZE = 16

    key = jax.random.PRNGKey(0)
    k1, k2, k3, k4 = jax.random.split(key, 4)

    meas1 = jax.random.normal(k1, (B, D), dtype=jnp.float32)
    meas2 = jax.random.normal(k2, (B, D), dtype=jnp.float32)

    # Deterministic Linear(1, output_size) parameters (PyTorch bound 1/sqrt(1)=1).
    weight = jax.random.uniform(k3, (OUTPUT_SIZE, 1), minval=-1.0, maxval=1.0,
                                dtype=jnp.float32)
    bias = jax.random.uniform(k4, (OUTPUT_SIZE,), minval=-1.0, maxval=1.0,
                              dtype=jnp.float32)

    # Main case: B=200 -> 25 packed rows, tile=16 -> grid=2 with a partial
    # final block (exercises the pipelined + clipped-store paths).
    ref = reference_forward(meas1, meas2, weight, bias)
    out = jax.block_until_ready(classifier_forward(meas1, meas2, weight, bias))
    assert out.shape == (B, OUTPUT_SIZE), out.shape
    # Tolerance covers MXU bf16-pass rounding of the reductions; any packing /
    # indexing bug would produce O(1) errors.
    assert jnp.allclose(out, ref, atol=2e-3, rtol=2e-3), (
        f"max abs err = {float(jnp.max(jnp.abs(out - ref)))}")

    # Padding path: batch not a multiple of the 8-row pack (52 -> padded to 56,
    # 7 packed rows, single full-extent block).
    B2 = 52
    ref2 = reference_forward(meas1[:B2], meas2[:B2], weight, bias)
    out2 = jax.block_until_ready(
        classifier_forward(meas1[:B2], meas2[:B2], weight, bias))
    assert out2.shape == (B2, OUTPUT_SIZE), out2.shape
    assert jnp.allclose(out2, ref2, atol=2e-3, rtol=2e-3), (
        f"max abs err (padded batch) = {float(jnp.max(jnp.abs(out2 - ref2)))}")

    print("KERNEL_OK")
</pallas_src>

<mosaic_0001>
module attributes {stable_mosaic.version = 11 : i64} {
  func.func @_classifier_kernel(%arg0: i32, %arg1: memref<16x256xf32, #tpu.memory_space<vmem>>, %arg2: memref<16x256xf32, #tpu.memory_space<vmem>>, %arg3: memref<256x128xf32, #tpu.memory_space<vmem>>, %arg4: memref<2x128xf32, #tpu.memory_space<vmem>>, %arg5: memref<16x128xf32, #tpu.memory_space<vmem>>) attributes {dimension_semantics = [#tpu.dimension_semantics<parallel>], iteration_bounds = array<i64: 2>, scalar_prefetch = 0 : i64, scratch_operands = 0 : i64, tpu.core_type = #tpu.core_type<tc>, window_params = [{transform_indices = @transform_0, window_bounds = array<i64: 16, 256>}, {transform_indices = @transform_1, window_bounds = array<i64: 16, 256>}, {pipeline_mode = #tpu.pipeline_mode<synchronous>, transform_indices = @transform_2, window_bounds = array<i64: 256, 128>}, {pipeline_mode = #tpu.pipeline_mode<synchronous>, transform_indices = @transform_3, window_bounds = array<i64: 2, 128>}, {transform_indices = @transform_4, window_bounds = array<i64: 16, 128>}]} {
    %c0 = arith.constant 0 : index
    %c0_0 = arith.constant 0 : index
    %0 = vector.load %arg1[%c0, %c0_0] : memref<16x256xf32, #tpu.memory_space<vmem>>, vector<16x256xf32>
    %c0_1 = arith.constant 0 : index
    %c0_2 = arith.constant 0 : index
    %1 = vector.load %arg2[%c0_1, %c0_2] : memref<16x256xf32, #tpu.memory_space<vmem>>, vector<16x256xf32>
    %c0_3 = arith.constant 0 : index
    %c0_4 = arith.constant 0 : index
    %2 = vector.load %arg3[%c0_3, %c0_4] : memref<256x128xf32, #tpu.memory_space<vmem>>, vector<256x128xf32>
    %3 = arith.mulf %0, %1 : vector<16x256xf32>
    %cst = arith.constant dense<0.000000e+00> : vector<16x128xf32>
    %4 = tpu.matmul %3, %2, %cst {dimension_numbers = #tpu.dot_dimension_numbers<[1], [0], [0], [1], [0, 0, 1, 1], [], []>, precision = #tpu.contract_precision<fp32>} : vector<16x256xf32>, vector<256x128xf32>, vector<16x128xf32> -> vector<16x128xf32>
    %5 = arith.mulf %0, %0 : vector<16x256xf32>
    %cst_5 = arith.constant dense<0.000000e+00> : vector<16x128xf32>
    %6 = tpu.matmul %5, %2, %cst_5 {dimension_numbers = #tpu.dot_dimension_numbers<[1], [0], [0], [1], [0, 0, 1, 1], [], []>, precision = #tpu.contract_precision<fp32>} : vector<16x256xf32>, vector<256x128xf32>, vector<16x128xf32> -> vector<16x128xf32>
    %7 = arith.mulf %1, %1 : vector<16x256xf32>
    %cst_6 = arith.constant dense<0.000000e+00> : vector<16x128xf32>
    %8 = tpu.matmul %7, %2, %cst_6 {dimension_numbers = #tpu.dot_dimension_numbers<[1], [0], [0], [1], [0, 0, 1, 1], [], []>, precision = #tpu.contract_precision<fp32>} : vector<16x256xf32>, vector<256x128xf32>, vector<16x128xf32> -> vector<16x128xf32>
    %9 = arith.mulf %6, %8 : vector<16x128xf32>
    %cst_7 = arith.constant 9.99999996E-13 : f32
    %10 = vector.broadcast %cst_7 : f32 to vector<16x128xf32>
    %11 = arith.maximumf %9, %10 : vector<16x128xf32>
    %12 = math.rsqrt %11 : vector<16x128xf32>
    %13 = arith.mulf %4, %12 : vector<16x128xf32>
    %c0_8 = arith.constant 0 : index
    %c0_9 = arith.constant 0 : index
    %14 = vector.load %arg4[%c0_8, %c0_9] : memref<2x128xf32, #tpu.memory_space<vmem>>, vector<1x128xf32>
    %15 = vector.broadcast %14 : vector<1x128xf32> to vector<16x128xf32>
    %16 = arith.mulf %13, %15 : vector<16x128xf32>
    %c1 = arith.constant 1 : index
    %c0_10 = arith.constant 0 : index
    %17 = vector.load %arg4[%c1, %c0_10] : memref<2x128xf32, #tpu.memory_space<vmem>>, vector<1x128xf32>
    %18 = vector.broadcast %17 : vector<1x128xf32> to vector<16x128xf32>
    %19 = arith.addf %16, %18 : vector<16x128xf32>
    %c0_11 = arith.constant 0 : index
    %c0_12 = arith.constant 0 : index
    %20 = vector.load %arg5[%c0_11, %c0_12] : memref<16x128xf32, #tpu.memory_space<vmem>>, vector<16x128xf32>
    tpu.vector_store %arg5[%c0_11, %c0_12], %19 {strides = array<i32>} : memref<16x128xf32, #tpu.memory_space<vmem>>, vector<16x128xf32>,
    return
  }
  func.func @transform_0(%arg0: i32) -> (i32, i32) {
    %c0_i32 = arith.constant 0 : i32
    %c0_i32_0 = arith.constant 0 : i32
    return %arg0, %c0_i32 : i32, i32
  }
  func.func @transform_1(%arg0: i32) -> (i32, i32) {
    %c0_i32 = arith.constant 0 : i32
    %c0_i32_0 = arith.constant 0 : i32
    return %arg0, %c0_i32 : i32, i32
  }
  func.func @transform_2(%arg0: i32) -> (i32, i32) {
    %c0_i32 = arith.constant 0 : i32
    %c0_i32_0 = arith.constant 0 : i32
    %c0_i32_1 = arith.constant 0 : i32
    return %c0_i32, %c0_i32_0 : i32, i32
  }
  func.func @transform_3(%arg0: i32) -> (i32, i32) {
    %c0_i32 = arith.constant 0 : i32
    %c0_i32_0 = arith.constant 0 : i32
    %c0_i32_1 = arith.constant 0 : i32
    return %c0_i32, %c0_i32_0 : i32, i32
  }
  func.func @transform_4(%arg0: i32) -> (i32, i32) {
    %c0_i32 = arith.constant 0 : i32
    %c0_i32_0 = arith.constant 0 : i32
    return %arg0, %c0_i32 : i32, i32
  }
}

</mosaic_0001>

<bundles_post_ra>
// kernel: tpu_custom_call.1
= control target key start
LH: loop header
LB: loop body
LE: loop exit
PB: predicated region body
PF: predicated region fallthrough
CT: control target
= control target key end

     0   :  { %s4344_s0 = inlined_call_operand.hbm [shape: f32[25,256], index: 0, kind: input, shape index: {}]   ;;  %s4345_s1 = inlined_call_operand.hbm [shape: f32[25,256], index: 1, kind: input, shape index: {}]   ;;  %s4346_s2 = inlined_call_operand.hbm [shape: f32[256,128], index: 2, kind: input, shape index: {}]   ;;  %s4347_s3 = inlined_call_operand.vmem [shape: f32[2,128], index: 3, kind: input, shape index: {}]   ;;  %s4348_s4 = inlined_call_operand.hbm [shape: f32[25,128], index: 4, kind: output, shape index: {}]  }
   0x1   :  { %4553 = sst [smem:[#allocation117_spill]] %s4344_s0 }
   0x2   :  { %4554 = sst [smem:[#allocation118_spill]] %s4346_s2 }
   0x3   :  { %9 = vsyncpa [#allocation3], 0 }
   0x4   :  { %11 = vsyncpa [#allocation3 + $0x1], 0 }
   0x5   :  { %12 = vsyncpa [#allocation6], 0 }
   0x6   :  { %14 = vsyncpa [#allocation6 + $0x1], 0 }
   0x7   :  { %15 = vsyncpa [#allocation4], 0 }
   0x8   :  { %17 = vsyncpa [#allocation4 + $0x1], 0  ;;  %s3024_s15 = smov 0   ;;  %s3026_s16 = smov 0  }
   0x9   :  { %s3028_s17 = smov 0   ;;  %s3030_s18 = smov 0  }
   0xa LB: > { %s3045_s19 = sadd.s32 4294967295, %s2990_s18   ;;  %s2722_s20 = sadd.s32 4294967294, %s2990_s18   ;;  %s2990_s18 = sphi %s3030_s18, %s4856_s18   ;;  %s2986_s17 = sphi %s3028_s17, %s4855_s17   ;;  %s2982_s16 = sphi %s3026_s16, %s4854_s16   ;;  %s2978_s15 = sphi %s3024_s15, %s4853_s15  }
   0xb   : > { %p43_p0 = scmp.ne.s32.totalorder %s2982_s16, %s2978_s15  ;;  %p44_p1 = scmp.eq.s32.totalorder %s3045_s19, 0 }
   0xc   : > { %p135_p2 = scmp.eq.s32.totalorder %s3045_s19, 1  ;;  %p141_p3 = scmp.eq.s32.totalorder %s2722_s20, 1 }
   0xd   : > { %p3054_p4 = por %p44_p1, %p43_p0  ;;  %p2723_p5 = scmp.ge.s32.totalorder %s2990_s18, 1 }
   0xe   : > { %p3059_p6 = por %p141_p3, %p43_p0  ;;  %p148_p7 = scmp.lt.s32.totalorder %s2990_s18, 3 }
   0xf   : > { %s4557_s2 = sld [smem:[#allocation118_spill]]  ;;  %s2992_s27 = smov [#allocation7]  }
  0x10   : > { %p3067_p8 = pnand %p2723_p5, %p148_p7  ;;  %s161_s28 = sshll.u32 %s2992_s27, 4  ;;  %s162_s28 = int_to_ptr.vmem [resolvable:$true] %s161_s28 }
  0x11   : > { %s3077_s29 = sadd.s32 1, %s2990_s18   ;;  %s2993_s30 = smov 128  }
  0x12   : > { %p2759_p9 = pneg %p3067_p8  ;;  %s2994_s5 = smov 8  }
  0x13   : > { %s27_s6 = ssub.s32 %s2990_s18, %s3077_s29  ;;  %s30_s7 = sadd.s32 1, %s2986_s17 }
  0x14   : > { %p2760_p10 = pnand %p2759_p9, %p44_p1  ;;  %p28_p12 = scmp.eq.s32.totalorder %s27_s6, 0 }
  0x15   : > { %s159_s25 = sshll.u32 %s4557_s2, 4  ;;  %p37_p13 = scmp.ne.s32.totalorder %s2986_s17, %s2982_s16  ;;  %s160_s25 = int_to_ptr.hbm [resolvable:$true] %s159_s25 }
  0x16   : > { %2762 = dma.hbm_to_vmem [thread:$0]  (!%p2760_p10), %s160_s25, 4096, %s162_s28, [#allocation6], %s2993_s30, %s2993_s30, %s2994_s5  }
  0x17   : > { %p38_p0 = scmp.eq.s32.totalorder %s2990_s18, 0  ;;  %p2775_p3 = scmp.lt.s32.totalorder %s2990_s18, 2 }
  0x18   : > { %s3087_s8 = scalar_select %p28_p12, %s2986_s17, %s30_s7  }
  0x19   : > { %p39_p5 = por %p38_p0, %p37_p13  ;;  %p3091_p7 = por %p135_p2, %p37_p13 }
  0x1a   : > { %4559 = sst [smem:[#allocation13_spill]] %s3087_s8  ;;  %s178_s10 = sand.u32 1, %s2986_s17  }
  0x1b   : > { %s2745_s11 = sshll.u32 %s2990_s18, 5  ;;  %s3097_s12 = sshll.u32 %s178_s10, 5 }
  0x1c   : > { %s4561_s0 = sld [smem:[#allocation117_spill]]  ;;  %s182_s24 = scalar_lea.vmem [#allocation2], %s3097_s12 }
  0x1d   : > { %s191_s25 = sshll.u32 %s182_s24, 4  ;;  %p3105_p9 = pnand %p2775_p3, %p39_p5  ;;  %s192_s25 = int_to_ptr.vmem [resolvable:$true] %s191_s25 }
  0x1e   : > { %s211_s5 = scalar_lea.hbm %s4345_s1, %s2745_s11  ;;  %s179_s6 = scalar_lea.sflag [#allocation3], %s178_s10 }
  0x1f   : > { %p2860_p10 = pneg %p3105_p9 }
  0x22   : > { %s188_s20 = scalar_lea.hbm %s4561_s0, %s2745_s11  ;;  %s2863_s24 = scalar_lea.hbm %s4561_s0, 64 }
  0x23   : > { %s189_s23 = sshll.u32 %s188_s20, 4  ;;  %s190_s23 = int_to_ptr.hbm [resolvable:$true] %s189_s23 }
  0x24   : > { %s2856_s7 = sshra.s32 %s190_s23, 4  ;;  %s2857_s7 = int_to_ptr.hbm [resolvable:$true] %s2856_s7 }
  0x25   : > { %s2858_s13 = scalar_lea.hbm %s2857_s7, 32  ;;  %p2864_p0 = scmp.lt.s32.totalorder %s2857_s7, %s4561_s0 }
  0x26   : > { %p2859_p2 = scmp.ne.s32.totalorder %s2857_s7, %s2858_s13  ;;  %p2865_p3 = scmp.lt.s32.totalorder %s2863_s24, %s2858_s13 }
  0x28   : > { %p2861_p12 = pnand %p2860_p10, %p2859_p2  ;;  %p2866_p5 = por %p2865_p3, %p2864_p0 }
  0x2a   : > { %p2862_p13 = pneg %p2861_p12 }
  0x2c   : > { %p2867_p11 = pnand %p2866_p5, %p2862_p13 }
  0x2e   : > { %2870 = shalt.err (!%p2867_p11)
}
  0x2f   : > { %s2995_s10 = smov 256   ;;  %s2996_s11 = smov 16  }
  0x30   : > { %2766 = dma.hbm_to_vmem [thread:$0]  (!%p3105_p9), %s190_s23, 512, %s192_s25, %s179_s6, %s2995_s10, %s2995_s10, %s2996_s11  }
  0x31   : > { %s212_s30 = sshll.u32 %s211_s5, 4  ;;  %s205_s8 = scalar_lea.vmem [#allocation5], %s3097_s12  ;;  %s213_s30 = int_to_ptr.hbm [resolvable:$true] %s212_s30 }
  0x32   : > { %s214_s14 = sshll.u32 %s205_s8, 4  ;;  %s201_s20 = sand.u32 1, %s2990_s18   ;;  %s215_s14 = int_to_ptr.vmem [resolvable:$true] %s214_s14 }
  0x33   : > { %s202_s2 = scalar_lea.sflag [#allocation6], %s201_s20  ;;  %s2886_s7 = sshra.s32 %s213_s30, 4  ;;  %s2887_s7 = int_to_ptr.hbm [resolvable:$true] %s2886_s7 }
  0x34   : > { %s2888_s13 = scalar_lea.hbm %s2887_s7, 32  ;;  %s2893_s0 = scalar_lea.hbm %s4345_s1, 64 }
  0x35   : > { %p2889_p2 = scmp.ne.s32.totalorder %s2887_s7, %s2888_s13  ;;  %p2894_p13 = scmp.lt.s32.totalorder %s2887_s7, %s4345_s1 }
  0x36   : > { %p2895_p0 = scmp.lt.s32.totalorder %s2893_s0, %s2888_s13 }
  0x37   : > { %p2891_p11 = pnand %p2889_p2, %p2860_p10 }
  0x38   : > { %p2896_p3 = por %p2895_p0, %p2894_p13 }
  0x39   : > { %p2892_p12 = pneg %p2891_p11 }
  0x3b   : > { %p2897_p5 = pnand %p2896_p3, %p2892_p12 }
  0x3d   : > { %2900 = shalt.err (!%p2897_p5)
}
  0x3e   : > { %2769 = dma.hbm_to_vmem [thread:$0]  (!%p3105_p9), %s213_s30, 512, %s215_s14, %s202_s2, %s2995_s10, %s2995_s10, %s2996_s11  }
  0x3f   : > { %226 = sbr.rel (%p3067_p8) target bundleno = 605 (0x25d), region = 36 }
  0x44   : > { %s3141_s8 = sand.u32 1, %s2982_s16  }
  0x45   : > { %s2735_s12 = sshll.u32 %s3141_s8, 5  ;;  %s229_s5 = scalar_lea.sflag [#allocation3], %s3141_s8 }
  0x46   : > { %s3145_s6 = scalar_lea.vmem [#allocation2], %s2735_s12 }
  0x47   : > { %2961 = dma.done.wait (%p3054_p4), %s229_s5, 512  }
  0x48   : > { %2963 = vsyncadd (%p3054_p4), %s229_s5, 4294966784  ;;  %s238_s0 = sand.u32 1, %s3045_s19   ;;  %s3152_s27 = scalar_lea.vmem [#allocation5], %s2735_s12 }
  0x49   : > { %s239_s26 = scalar_lea.sflag [#allocation6], %s238_s0 }
  0x4a   : > { %2965 = dma.done.wait (%p3054_p4), %s239_s26, 512  }
  0x4b   : > { %2967 = vsyncadd (%p3054_p4), %s239_s26, 4294966784 }
  0x4c   : > { %2969 = dma.done.wait (%p44_p1), [#allocation6], 4096  }
  0x4d   : > { %2971 = vsyncadd (%p44_p1), [#allocation6], 4294963200  ;;  %v304_v0 = vld [vmem:[#allocation7 + $0x78] sm:$0xff]  ;;  %v303_v1 = vld [vmem:[#allocation7 + $0x70] sm:$0xff]  ;;  %s2738_s14 = sshll.u32 %s3141_s8, 4  ;;  %s2748_s20 = sshll.u32 %s3045_s19, 4 }
  0x4e   : > { %v302_v2 = vld [vmem:[#allocation7 + $0x68] sm:$0xff]  ;;  %v3162_v3 = vand.u32 4294901760, %v304_v0  ;;  %v3164_v4 = vand.u32 4294901760, %v303_v1  ;;  %v301_v6 = vld [vmem:[#allocation7 + $0x60] sm:$0xff]  ;;  %v300_v7 = vld [vmem:[#allocation7 + $0x58] sm:$0xff]  ;;  %s2613_s13 = scalar_lea.hbm %s4348_s4, %s2748_s20  ;;  %s277_s24 = scalar_lea.vmem [#allocation8], %s2738_s14 }
  0x4f   : > { %v3166_v5 = vand.u32 4294901760, %v302_v2  ;;  %v299_v8 = vld [vmem:[#allocation7 + $0x50] sm:$0xff]  ;;  %v3168_v9 = vand.u32 4294901760, %v301_v6  ;;  %v3170_v10 = vand.u32 4294901760, %v300_v7  ;;  %v298_v12 = vld [vmem:[#allocation7 + $0x48] sm:$0xff]  ;;  %v297_v13 = vld [vmem:[#allocation7 + $0x40] sm:$0xff] }
  0x50   : > { %4563 = vst [vmem:[#allocation14_spill] sm:$0xff] %v3162_v3  ;;  %v3172_v11 = vand.u32 4294901760, %v299_v8  ;;  %326 = vmatpush.msra.mxu0 %v3162_v3  ;;  %v3176_v14 = vsub.f32 %v304_v0, %v3162_v3  ;;  %v3179_v15 = vsub.f32 %v303_v1, %v3164_v4  ;;  %539 = vmatpush.msra.mxu3 %v3162_v3  ;;  %v3185_v17 = vand.u32 4294901760, %v298_v12  ;;  %v296_v18 = vld [vmem:[#allocation7 + $0x38] sm:$0xff]  ;;  %v295_v26 = vld [vmem:[#allocation7 + $0x30] sm:$0xff]  ;;  %v294_v36 = vld [vmem:[#allocation7 + $0x28] sm:$0xff] }
  0x51   : > { %4564 = vst [vmem:[#allocation15_spill] sm:$0xff] %v3164_v4  ;;  %v3183_v16 = vsub.f32 %v302_v2, %v3166_v5  ;;  %v3188_v19 = vsub.f32 %v301_v6, %v3168_v9  ;;  %v3191_v20 = vsub.f32 %v300_v7, %v3170_v10  ;;  %v3207_v25 = vand.u32 4294901760, %v297_v13  ;;  %v293_v42 = vld [vmem:[#allocation7 + $0x20] sm:$0xff]  ;;  %v292_v48 = vld [vmem:[#allocation7 + $0x18] sm:$0xff]  ;;  %v291_v54 = vld [vmem:[#allocation7 + $0x10] sm:$0xff]  ;;  %s2614_s28 = sshll.u32 %s277_s24, 4  ;;  %s2615_s28 = int_to_ptr.vmem [resolvable:$true] %s2614_s28 }
  0x52   : > { %4565 = vst [vmem:[#allocation16_spill] sm:$0xff] %v3166_v5  ;;  %v3194_v21 = vsub.f32 %v299_v8, %v3172_v11  ;;  %328 = vmatpush.msra.mxu0 %v3164_v4  ;;  %481 = vmatpush.msra.mxu2 %v3176_v14  ;;  %v3199_v22 = vand.u32 4294901760, %v3176_v14  ;;  %v3202_v23 = vand.u32 4294901760, %v3179_v15  ;;  %v3213_v28 = vand.u32 4294901760, %v296_v18  ;;  %v320_v59 = vld [vmem:[#allocation7 + $0xf8] sm:$0xff]  ;;  %v290_v61 = vld [vmem:[#allocation7 + $0x8] sm:$0xff] }
  0x53   : > { %4566 = vst [vmem:[#allocation17_spill] sm:$0xff] %v3168_v9  ;;  %v3205_v24 = vand.u32 4294901760, %v3183_v16  ;;  %541 = vmatpush.msra.mxu3 %v3164_v4  ;;  %v3211_v27 = vand.u32 4294901760, %v3188_v19  ;;  %v3216_v29 = vsub.f32 %v298_v12, %v3185_v17  ;;  %v3227_v33 = vand.u32 4294901760, %v3191_v20  ;;  %v289_v2 = vld [vmem:[#allocation7] sm:$0xff]  ;;  %v319_v6 = vld [vmem:[#allocation7 + $0xf0] sm:$0xff] }
  0x54   : > { %4567 = vst [vmem:[#allocation18_spill] sm:$0xff] %v3170_v10  ;;  %330 = vmatpush.msra.mxu0 %v3166_v5  ;;  %484 = vmatpush.msra.mxu2 %v3179_v15  ;;  %v377_v30 = vsub.f32 %v3176_v14, %v3199_v22  ;;  %v383_v31 = vsub.f32 %v3179_v15, %v3202_v23  ;;  %v3230_v34 = vand.u32 4294901760, %v295_v26  ;;  %v3233_v35 = vand.u32 4294901760, %v3194_v21  ;;  %s2616_s23 = sshll.u32 %s2613_s13, 4  ;;  %s2602_s19 = scalar_lea.sflag [#allocation4], %s3141_s8  ;;  %s2617_s23 = int_to_ptr.hbm [resolvable:$true] %s2616_s23 }
  0x55   : > { %4568 = vst [vmem:[#allocation19_spill] sm:$0xff] %v3172_v11  ;;  %v389_v32 = vsub.f32 %v3183_v16, %v3205_v24  ;;  %543 = vmatpush.msra.mxu3 %v3166_v5  ;;  %v395_v39 = vsub.f32 %v3188_v19, %v3211_v27  ;;  %v3244_v40 = vsub.f32 %v297_v13, %v3207_v25  ;;  %v3248_v41 = vand.u32 4294901760, %v3216_v29  ;;  %s2930_s25 = sshra.s32 %s2617_s23, 4  ;;  %s2936_s0 = scalar_lea.hbm %s4348_s4, 32  ;;  %s2931_s25 = int_to_ptr.hbm [resolvable:$true] %s2930_s25 }
  0x56   : > { %4569 = vst [vmem:[#allocation20_spill] sm:$0xff] %v3176_v14  ;;  %332 = vmatpush.msra.mxu0 %v3168_v9  ;;  %v3236_v37 = vand.u32 4294901760, %v377_v30  ;;  %487 = vmatpush.msra.mxu2 %v3183_v16  ;;  %v3239_v38 = vand.u32 4294901760, %v383_v31  ;;  %v401_v44 = vsub.f32 %v3191_v20, %v3227_v33  ;;  %v3256_v45 = vand.u32 4294901760, %v294_v36  ;;  %v318_v30 = vld [vmem:[#allocation7 + $0xe8] sm:$0xff]  ;;  %s2932_s12 = scalar_lea.hbm %s2931_s25, 16  ;;  %p2937_p9 = scmp.lt.s32.totalorder %s2931_s25, %s4348_s4 }
  0x57   : > { %4570 = vst [vmem:[#allocation21_spill] sm:$0xff] %v3179_v15  ;;  %545 = vmatpush.msra.mxu3 %v3168_v9  ;;  %v3252_v43 = vand.u32 4294901760, %v389_v32  ;;  %v3259_v46 = vsub.f32 %v296_v18, %v3213_v28  ;;  %v407_v47 = vsub.f32 %v3194_v21, %v3233_v35  ;;  %v3267_v49 = vand.u32 4294901760, %v395_v39  ;;  %v312_v15 = vld [vmem:[#allocation7 + $0xb8] sm:$0xff]  ;;  %p2933_p1 = scmp.ne.s32.totalorder %s2931_s25, %s2932_s12  ;;  %p2938_p10 = scmp.lt.s32.totalorder %s2936_s0, %s2932_s12 }
  0x58   : > { %4571 = vst [vmem:[#allocation22_spill] sm:$0xff] %v3183_v16  ;;  %334 = vmatpush.msra.mxu0 %v3170_v10  ;;  %379 = vmatpush.msra.mxu1 %v3236_v37  ;;  %v3269_v50 = vand.u32 4294901760, %v293_v42  ;;  %v3272_v51 = vand.u32 4294901760, %v3244_v40  ;;  %v3275_v52 = vsub.f32 %v295_v26, %v3230_v34  ;;  %v413_v53 = vsub.f32 %v3216_v29, %v3248_v41 }
  0x59   : > { %4572 = vst [vmem:[#allocation23_spill] sm:$0xff] %v3185_v17  ;;  %490 = vmatpush.msra.mxu2 %v3188_v19  ;;  %547 = vmatpush.msra.mxu3 %v3170_v10  ;;  %v3283_v55 = vand.u32 4294901760, %v401_v44  ;;  %v3285_v56 = vand.u32 4294901760, %v292_v48  ;;  %v3288_v57 = vand.u32 4294901760, %v3259_v46  ;;  %v3291_v58 = vsub.f32 %v294_v36, %v3256_v45  ;;  %p2934_p4 = pnand %p2933_p1, %p3091_p7  ;;  %p2939_p2 = por %p2938_p10, %p2937_p9 }
  0x5a   : > { %4573 = vst [vmem:[#allocation24_spill] sm:$0xff] %v3188_v19  ;;  %336 = vmatpush.msra.mxu0 %v3172_v11  ;;  %385 = vmatpush.msra.mxu1 %v3239_v38  ;;  %v3294_v60 = vand.u32 4294901760, %v407_v47  ;;  %v419_v62 = vsub.f32 %v3244_v40, %v3272_v51  ;;  %v3301_v63 = vand.u32 4294901760, %v291_v54  ;;  %v3304_v0 = vand.u32 4294901760, %v3275_v52  ;;  %v317_v47 = vld [vmem:[#allocation7 + $0xe0] sm:$0xff] }
  0x5b   : > { %4574 = vst [vmem:[#allocation25_spill] sm:$0xff] %v3191_v20  ;;  %493 = vmatpush.msra.mxu2 %v3191_v20  ;;  %549 = vmatpush.msra.mxu3 %v3172_v11  ;;  %v3307_v1 = vsub.f32 %v293_v42, %v3269_v50  ;;  %v3310_v7 = vand.u32 4294901760, %v413_v53  ;;  %v3313_v8 = vand.u32 4294901760, %v320_v59  ;;  %v425_v12 = vsub.f32 %v3259_v46, %v3288_v57  ;;  %v313_v19 = vld [vmem:[#allocation7 + $0xc0] sm:$0xff]  ;;  %p2935_p8 = pneg %p2934_p4 }
  0x5c   : > { %4575 = vst [vmem:[#allocation26_spill] sm:$0xff] %v3194_v21  ;;  %338 = vmatpush.msra.mxu0 %v3185_v17  ;;  %391 = vmatpush.msra.mxu1 %v3252_v43  ;;  %v3319_v13 = vand.u32 4294901760, %v290_v61  ;;  %v3322_v18 = vand.u32 4294901760, %v3291_v58  ;;  %v3325_v26 = vsub.f32 %v292_v48, %v3285_v56  ;;  %v3329_v31 = vand.u32 4294901760, %v289_v2 }
  0x5d   : > { %4576 = vst [vmem:[#allocation27_spill] sm:$0xff] %v3199_v22  ;;  %496 = vmatpush.msra.mxu2 %v3194_v21  ;;  %551 = vmatpush.msra.mxu3 %v3185_v17  ;;  %v3331_v32 = vand.u32 4294901760, %v319_v6  ;;  %v3335_v36 = vand.u32 4294901760, %v419_v62  ;;  %v431_v39 = vsub.f32 %v3275_v52, %v3304_v0  ;;  %v3340_v42 = vand.u32 4294901760, %v3307_v1  ;;  %p2940_p11 = pnand %p2939_p2, %p2935_p8 }
  0x5e   : > { %4577 = vst [vmem:[#allocation28_spill] sm:$0xff] %v3202_v23  ;;  %340 = vmatpush.msra.mxu0 %v3207_v25  ;;  %397 = vmatpush.msra.mxu1 %v3267_v49  ;;  %v3343_v44 = vsub.f32 %v291_v54, %v3301_v63  ;;  %v3348_v48 = vsub.f32 %v320_v59, %v3313_v8  ;;  %v3350_v53 = vand.u32 4294901760, %v318_v30  ;;  %v3354_v62 = vand.u32 4294901760, %v425_v12 }
  0x5f   : > { %4578 = vst [vmem:[#allocation29_spill] sm:$0xff] %v3205_v24  ;;  %499 = vmatpush.msra.mxu2 %v3216_v29  ;;  %553 = vmatpush.msra.mxu3 %v3207_v25  ;;  %v437_v54 = vsub.f32 %v3291_v58, %v3322_v18  ;;  %v3367_v59 = vsub.f32 %v289_v2, %v3329_v31  ;;  %v3372_v12 = vand.u32 4294901760, %v317_v47  ;;  %v3455_v14 = vand.u32 4294901760, %v313_v19 }
  0x60   : > { %4579 = vst [vmem:[#allocation30_spill] sm:$0xff] %v3207_v25  ;;  %342 = vmatpush.msra.mxu0 %v3213_v28  ;;  %403 = vmatpush.msra.mxu1 %v3283_v55  ;;  %v3386_v2 = vand.u32 4294901760, %v3348_v48 }
  0x61   : > { %4580 = vst [vmem:[#allocation31_spill] sm:$0xff] %v3211_v27  ;;  %502 = vmatpush.msra.mxu2 %v3244_v40  ;;  %555 = vmatpush.msra.mxu3 %v3213_v28 }
  0x62   : > { %4581 = vst [vmem:[#allocation32_spill] sm:$0xff] %v3216_v29  ;;  %344 = vmatpush.msra.mxu0 %v3230_v34  ;;  %409 = vmatpush.msra.mxu1 %v3294_v60  ;;  %v3376_v29 = vand.u32 4294901760, %v431_v39  ;;  %v3393_v39 = vand.u32 4294901760, %v437_v54  ;;  %v3411_v54 = vsub.f32 %v317_v47, %v3372_v12  ;;  %v749_v47 = vsub.f32 %v3348_v48, %v3386_v2 }
  0x63   : > { %4582 = vst [vmem:[#allocation33_spill] sm:$0xff] %v3227_v33  ;;  %505 = vmatpush.msra.mxu2 %v3259_v46  ;;  %557 = vmatpush.msra.mxu3 %v3230_v34 }
  0x64   : > { %4583 = vst [vmem:[#allocation34_spill] sm:$0xff] %v3233_v35  ;;  %346 = vmatpush.msra.mxu0 %v3256_v45  ;;  %415 = vmatpush.msra.mxu1 %v3310_v7 }
  0x65   : > { %4584 = vst [vmem:[#allocation35_spill] sm:$0xff] %v3236_v37  ;;  %508 = vmatpush.msra.mxu2 %v3275_v52  ;;  %559 = vmatpush.msra.mxu3 %v3256_v45 }
  0x66   : > { %4585 = vst [vmem:[#allocation36_spill] sm:$0xff] %v3239_v38  ;;  %348 = vmatpush.msra.mxu0 %v3269_v50  ;;  %421 = vmatpush.msra.mxu1 %v3335_v36 }
  0x67   : > { %4586 = vst [vmem:[#allocation37_spill] sm:$0xff] %v3244_v40  ;;  %v3359_v40 = vand.u32 4294901760, %v3325_v26  ;;  %511 = vmatpush.msra.mxu2 %v3291_v58  ;;  %561 = vmatpush.msra.mxu3 %v3269_v50 }
  0x68   : > { %4587 = vst [vmem:[#allocation38_spill] sm:$0xff] %v3248_v41  ;;  %350 = vmatpush.msra.mxu0 %v3285_v56  ;;  %427 = vmatpush.msra.mxu1 %v3354_v62 }
  0x69   : > { %4588 = vst [vmem:[#allocation39_spill] sm:$0xff] %v3252_v43  ;;  %514 = vmatpush.msra.mxu2 %v3307_v1  ;;  %563 = vmatpush.msra.mxu3 %v3285_v56 }
  0x6a   : > { %4589 = vst [vmem:[#allocation40_spill] sm:$0xff] %v3259_v46  ;;  %v3362_v46 = vsub.f32 %v290_v61, %v3319_v13  ;;  %v443_v61 = vsub.f32 %v3307_v1, %v3340_v42  ;;  %352 = vmatpush.msra.mxu0 %v3301_v63  ;;  %433 = vmatpush.msra.mxu1 %v3376_v29 }
  0x6b   : > { %4590 = vst [vmem:[#allocation41_spill] sm:$0xff] %v3267_v49  ;;  %517 = vmatpush.msra.mxu2 %v3325_v26  ;;  %565 = vmatpush.msra.mxu3 %v3301_v63 }
  0x6c   : > { %4591 = vst [vmem:[#allocation42_spill] sm:$0xff] %v3272_v51  ;;  %v3415_v20 = vand.u32 4294901760, %v443_v61  ;;  %354 = vmatpush.msra.mxu0 %v3319_v13  ;;  %439 = vmatpush.msra.mxu1 %v3393_v39 }
  0x6d   : > { %4592 = vst [vmem:[#allocation43_spill] sm:$0xff] %v3275_v52  ;;  %v3381_v52 = vand.u32 4294901760, %v3343_v44  ;;  %520 = vmatpush.msra.mxu2 %v3343_v44  ;;  %567 = vmatpush.msra.mxu3 %v3319_v13 }
  0x6e   : > { %4593 = vst [vmem:[#allocation44_spill] sm:$0xff] %v3283_v55  ;;  %v315_v55 = vld [vmem:[#allocation7 + $0xd0] sm:$0xff]  ;;  %356 = vmatpush.msra.mxu0 %v3329_v31  ;;  %445 = vmatpush.msra.mxu1 %v3415_v20 }
  0x6f   : > { %4594 = vst [vmem:[#allocation45_spill] sm:$0xff] %v3288_v57  ;;  %v3419_v43 = vand.u32 4294901760, %v315_v55  ;;  %523 = vmatpush.msra.mxu2 %v3362_v46  ;;  %569 = vmatpush.msra.mxu3 %v3329_v31 }
  0x70   : > { %4595 = vst [vmem:[#allocation46_spill] sm:$0xff] %v3291_v58  ;;  %v3398_v58 = vand.u32 4294901760, %v3362_v46  ;;  %586 = vmatpush.msrb.mxu0 %v3199_v22 }
  0x71   : > { %4596 = vst [vmem:[#allocation47_spill] sm:$0xff] %v3294_v60  ;;  %v316_v60 = vld [vmem:[#allocation7 + $0xd8] sm:$0xff]  ;;  %526 = vmatpush.msra.mxu2 %v3367_v59 }
  0x72   : > { %4597 = vst [vmem:[#allocation48_spill] sm:$0xff] %v3301_v63  ;;  %v3400_v21 = vand.u32 4294901760, %v316_v60  ;;  %v3464_v63 = vld [vmem:[%s3145_s6] sm:$0xff]  ;;  %590 = vmatpush.msrb.mxu0 %v3202_v23 }
  0x73   : > { %4598 = vst [vmem:[#allocation49_spill] sm:$0xff] %v3304_v0  ;;  %698 = vmatpush.msrb.mxu2 %v3313_v8 }
  0x74   : > { %4599 = vst [vmem:[#allocation50_spill] sm:$0xff] %v3307_v1  ;;  %v455_v1 = vsub.f32 %v3343_v44, %v3381_v52  ;;  %594 = vmatpush.msrb.mxu0 %v3205_v24 }
  0x75   : > { %4600 = vst [vmem:[#allocation51_spill] sm:$0xff] %v3310_v7  ;;  %v3370_v7 = vsub.f32 %v319_v6, %v3331_v32  ;;  %v3389_v6 = vsub.f32 %v318_v30, %v3350_v53  ;;  %v3405_v30 = vand.u32 4294901760, %v3367_v59  ;;  %700 = vmatpush.msrb.mxu2 %v3331_v32 }
  0x76   : > { %4601 = vst [vmem:[#allocation52_spill] sm:$0xff] %v3319_v13  ;;  %598 = vmatpush.msrb.mxu0 %v3211_v27 }
  0x77   : > { %4602 = vst [vmem:[#allocation53_spill] sm:$0xff] %v3322_v18  ;;  %v3408_v49 = vand.u32 4294901760, %v3370_v7  ;;  %v3426_v38 = vand.u32 4294901760, %v3389_v6  ;;  %v467_v16 = vsub.f32 %v3367_v59, %v3405_v30  ;;  %702 = vmatpush.msrb.mxu2 %v3350_v53 }
  0x78   : > { %4603 = vst [vmem:[#allocation54_spill] sm:$0xff] %v3325_v26  ;;  %602 = vmatpush.msrb.mxu0 %v3227_v33 }
  0x79   : > { %4604 = vst [vmem:[#allocation55_spill] sm:$0xff] %v3329_v31  ;;  %v761_v13 = vsub.f32 %v3389_v6, %v3426_v38  ;;  %v3481_v22 = vand.u32 4294901760, %v467_v16  ;;  %v3493_v31 = vsub.f32 %v313_v19, %v3455_v14  ;;  %704 = vmatpush.msrb.mxu2 %v3372_v12 }
  0x7a   : > { %4605 = vst [vmem:[#allocation56_spill] sm:$0xff] %v3335_v36  ;;  %v449_v36 = vsub.f32 %v3325_v26, %v3359_v40  ;;  %v3435_v26 = vsub.f32 %v316_v60, %v3400_v21  ;;  %v3450_v60 = vand.u32 4294901760, %v455_v1  ;;  %606 = vmatpush.msrb.mxu0 %v3233_v35 }
  0x7b   : > { %4606 = vst [vmem:[#allocation57_spill] sm:$0xff] %v3340_v42  ;;  %706 = vmatpush.msrb.mxu2 %v3400_v21 }
  0x7c   : > { %4607 = vst [vmem:[#allocation58_spill] sm:$0xff] %v3343_v44  ;;  %v3430_v61 = vand.u32 4294901760, %v449_v36  ;;  %v755_v36 = vsub.f32 %v3370_v7, %v3408_v49  ;;  %v3453_v44 = vsub.f32 %v315_v55, %v3419_v43  ;;  %v3472_v55 = vand.u32 4294901760, %v3435_v26  ;;  %610 = vmatpush.msrb.mxu0 %v3248_v41 }
  0x7d   : > { %4608 = vst [vmem:[#allocation59_spill] sm:$0xff] %v3348_v48  ;;  %708 = vmatpush.msrb.mxu2 %v3419_v43 }
  0x7e   : > { %4609 = vst [vmem:[#allocation60_spill] sm:$0xff] %v3354_v62  ;;  %v314_v62 = vld [vmem:[#allocation7 + $0xc8] sm:$0xff]  ;;  %451 = vmatpush.msra.mxu1 %v3430_v61  ;;  %614 = vmatpush.msrb.mxu0 %v3272_v51 }
  0x7f   : > { %4610 = vst [vmem:[#allocation61_spill] sm:$0xff] %v3359_v40  ;;  %v3437_v37 = vand.u32 4294901760, %v314_v62 }
  0x80   : > { %4611 = vst [vmem:[#allocation62_spill] sm:$0xff] %v3362_v46  ;;  %457 = vmatpush.msra.mxu1 %v3450_v60  ;;  %618 = vmatpush.msrb.mxu0 %v3288_v57 }
  0x81   : > { %4612 = vst [vmem:[#allocation63_spill] sm:$0xff] %v3367_v59  ;;  %v773_v59 = vsub.f32 %v3435_v26, %v3472_v55  ;;  %710 = vmatpush.msrb.mxu2 %v3437_v37 }
  0x82   : > { %4613 = vst [vmem:[#allocation64_spill] sm:$0xff] %v3370_v7  ;;  %622 = vmatpush.msrb.mxu0 %v3304_v0 }
  0x83   : > { %4614 = vst [vmem:[#allocation65_spill] sm:$0xff] %v3376_v29  ;;  %v461_v29 = vsub.f32 %v3362_v46, %v3398_v58  ;;  %v3475_v46 = vsub.f32 %v314_v62, %v3437_v37  ;;  %v3490_v62 = vand.u32 4294901760, %v3453_v44  ;;  %712 = vmatpush.msrb.mxu2 %v3455_v14 }
  0x84   : > { %4615 = vst [vmem:[#allocation66_spill] sm:$0xff] %v3381_v52  ;;  %626 = vmatpush.msrb.mxu0 %v3322_v18 }
  0x85   : > { %4616 = vst [vmem:[#allocation67_spill] sm:$0xff] %v3386_v2  ;;  %v311_v2 = vld [vmem:[#allocation7 + $0xb0] sm:$0xff]  ;;  %v3468_v1 = vand.u32 4294901760, %v461_v29  ;;  %v3507_v19 = vand.u32 4294901760, %v3475_v46 }
  0x86   : > { %4617 = vst [vmem:[#allocation68_spill] sm:$0xff] %v3393_v39  ;;  %v3446_v39 = vand.u32 4294901760, %v3411_v54  ;;  %v3495_v23 = vand.u32 4294901760, %v311_v2  ;;  %630 = vmatpush.msrb.mxu0 %v3340_v42 }
  0x87   : > { %4618 = vst [vmem:[#allocation69_spill] sm:$0xff] %v3398_v58  ;;  %463 = vmatpush.msra.mxu1 %v3468_v1 }
  0x88   : > { %4619 = vst [vmem:[#allocation70_spill] sm:$0xff] %v3408_v49  ;;  %v3459_v49 = vand.u32 4294901760, %v749_v47  ;;  %v3477_v47 = vand.u32 4294901760, %v312_v15  ;;  %v767_v29 = vsub.f32 %v3411_v54, %v3446_v39  ;;  %634 = vmatpush.msrb.mxu0 %v3359_v40 }
  0x89   : > { %4620 = vst [vmem:[#allocation71_spill] sm:$0xff] %v3415_v20  ;;  %v285_v20 = vld [vmem:[%s3152_s27] sm:$0xff]  ;;  %469 = vmatpush.msra.mxu1 %v3481_v22 }
  0x8a   : > { %4621 = vst [vmem:[#allocation72_spill] sm:$0xff] %v3426_v38  ;;  %v3483_v38 = vand.u32 4294901760, %v755_v36  ;;  %v321_v16 = vmul.f32 %v285_v20, %v3464_v63  ;;  %751 = vmatpush.msrb.mxu3 %v3459_v49  ;;  %v3500_v36 = vand.u32 4294901760, %v761_v13  ;;  %v3516_v13 = vand.u32 4294901760, %v767_v29  ;;  %714 = vmatpush.msrb.mxu2 %v3477_v47 }
  0x8b   : > { %4622 = vst [vmem:[#allocation73_spill] sm:$0xff] %v3430_v61  ;;  %v310_v61 = vld [vmem:[#allocation7 + $0xa8] sm:$0xff]  ;;  %657 = vmatpush.msrb.mxu1 %v3162_v3  ;;  %v3534_v29 = vand.u32 4294901760, %v773_v59  ;;  %v3549_v3 = vld [vmem:[%s3145_s6 + $0x10] sm:$0xff]  ;;  %638 = vmatpush.msrb.mxu0 %v3381_v52 }
  0x8c   : > { %4623 = vst [vmem:[#allocation74_spill] sm:$0xff] %v3446_v39  ;;  %v3512_v20 = vand.u32 4294901760, %v310_v61  ;;  %757 = vmatpush.msrb.mxu3 %v3483_v38  ;;  %v3528_v27 = vand.u32 4294901760, %v321_v16  ;;  %v287_v59 = vld [vmem:[%s3152_s27 + $0x10] sm:$0xff]  ;;  %716 = vmatpush.msrb.mxu2 %v3495_v23 }
  0x8d   : > { %4624 = vst [vmem:[#allocation75_spill] sm:$0xff] %v3450_v60  ;;  %v3510_v60 = vsub.f32 %v312_v15, %v3477_v47  ;;  %v3526_v15 = vsub.f32 %v311_v2, %v3495_v23  ;;  %659 = vmatpush.msrb.mxu1 %v3164_v4  ;;  %v307_v4 = vld [vmem:[#allocation7 + $0x90] sm:$0xff]  ;;  %642 = vmatpush.msrb.mxu0 %v3398_v58 }
  0x8e   : > { %4625 = vst [vmem:[#allocation76_spill] sm:$0xff] %v3453_v44  ;;  %763 = vmatpush.msrb.mxu3 %v3500_v36  ;;  %v3542_v24 = vsub.f32 %v310_v61, %v3512_v20  ;;  %v3562_v35 = vsub.f32 %v321_v16, %v3528_v27  ;;  %v323_v16 = vmul.f32 %v287_v59, %v3549_v3 }
  0x8f   : > { %4626 = vst [vmem:[#allocation77_spill] sm:$0xff] %v3459_v49  ;;  %v779_v49 = vsub.f32 %v3453_v44, %v3490_v62  ;;  %v3539_v2 = vand.u32 4294901760, %v3510_v60  ;;  %661 = vmatpush.msrb.mxu1 %v3166_v5  ;;  %v3583_v5 = vand.u32 4294901760, %v307_v4  ;;  %718 = vmatpush.msrb.mxu2 %v3512_v20 }
  0x90   : > { %4627 = vst [vmem:[#allocation78_spill] sm:$0xff] %v3464_v63  ;;  %v308_v63 = vld [vmem:[#allocation7 + $0x98] sm:$0xff]  ;;  %769 = vmatpush.msrb.mxu3 %v3516_v13  ;;  %v359_v59 = vand.u32 4294901760, %v3562_v35  ;;  %v3605_v51 = vand.u32 4294901760, %v323_v16  ;;  %529 = vmatmul.f32.vlgmr.msra.gmra.mxu2 %v3562_v35 }
  0x91   : > { %4628 = vst [vmem:[#allocation79_spill] sm:$0xff] %v3468_v1  ;;  %v3523_v1 = vand.u32 4294901760, %v3493_v31  ;;  %663 = vmatpush.msrb.mxu1 %v3168_v9  ;;  %v305_v9 = vld [vmem:[#allocation7 + $0x80] sm:$0xff]  ;;  %v3613_v57 = vsub.f32 %v307_v4, %v3583_v5  ;;  %646 = vmatpush.msrb.mxu0 %v3405_v30 }
  0x92   : > { %4629 = vst [vmem:[#allocation80_spill] sm:$0xff] %v3475_v46  ;;  %775 = vmatpush.msrb.mxu3 %v3534_v29  ;;  %v3629_v4 = vand.u32 4294901760, %v305_v9  ;;  %471 = vmatmul.f32.vlgmr.msra.gmra.mxu1 %v3528_v27 }
  0x93   : > { %4630 = vst [vmem:[#allocation81_spill] sm:$0xff] %v3481_v22  ;;  %v785_v22 = vsub.f32 %v3475_v46, %v3507_v19  ;;  %v791_v61 = vsub.f32 %v3493_v31, %v3523_v1  ;;  %665 = vmatpush.msrb.mxu1 %v3170_v10  ;;  %573 = vmatmul.f32.vlgmr.msra.gmra.mxu3 %v359_v59 }
  0x94   : > { %4631 = vst [vmem:[#allocation82_spill] sm:$0xff] %v3483_v38  ;;  %v309_v38 = vld [vmem:[#allocation7 + $0xa0] sm:$0xff] }
  0x95   : > { %4632 = vst [vmem:[#allocation83_spill] sm:$0xff] %v3490_v62  ;;  %v3546_v33 = vand.u32 4294901760, %v309_v38  ;;  %v3566_v62 = vand.u32 4294901760, %v308_v63  ;;  %667 = vmatpush.msrb.mxu1 %v3172_v11 }
  0x96   : > { %4633 = vst [vmem:[#allocation84_spill] sm:$0xff] %v3495_v23  ;;  %v3645_v23 = vand.u32 4294901760, %v3613_v57 }
  0x97   : > { %4634 = vst [vmem:[#allocation85_spill] sm:$0xff] %v3500_v36  ;;  %v3554_v36 = vand.u32 4294901760, %v779_v49  ;;  %v3570_v49 = vand.u32 4294901760, %v785_v22  ;;  %v3581_v41 = vsub.f32 %v309_v38, %v3546_v33  ;;  %v3587_v22 = vand.u32 4294901760, %v791_v61  ;;  %669 = vmatpush.msrb.mxu1 %v3185_v17  ;;  %720 = vmatpush.msrb.mxu2 %v3546_v33 }
  0x98   : > { %4635 = vst [vmem:[#allocation86_spill] sm:$0xff] %v3507_v19  ;;  %v3559_v19 = vand.u32 4294901760, %v3526_v15  ;;  %v3595_v38 = vsub.f32 %v308_v63, %v3566_v62 }
  0x99   : > { %4636 = vst [vmem:[#allocation87_spill] sm:$0xff] %v3510_v60  ;;  %781 = vmatpush.msrb.mxu3 %v3554_v36  ;;  %v3610_v63 = vand.u32 4294901760, %v3581_v41  ;;  %671 = vmatpush.msrb.mxu1 %v3207_v25 }
  0x9a   : > { %4637 = vst [vmem:[#allocation88_spill] sm:$0xff] %v3516_v13  ;;  %v797_v13 = vsub.f32 %v3510_v60, %v3539_v2  ;;  %v3627_v0 = vand.u32 4294901760, %v3595_v38  ;;  %722 = vmatpush.msrb.mxu2 %v3566_v62  ;;  %475 = vmatmul.f32.gmra.mxu1 %v3605_v51 }
  0x9b   : > { %4638 = vst [vmem:[#allocation89_spill] sm:$0xff] %v3523_v1  ;;  %v3575_v1 = vand.u32 4294901760, %v3542_v24  ;;  %787 = vmatpush.msrb.mxu3 %v3570_v49  ;;  %v815_v17 = vsub.f32 %v3581_v41, %v3610_v63  ;;  %673 = vmatpush.msrb.mxu1 %v3213_v28 }
  0x9c   : > { %4639 = vst [vmem:[#allocation90_spill] sm:$0xff] %v3526_v15  ;;  %v3599_v61 = vand.u32 4294901760, %v797_v13  ;;  %v3616_v13 = vld [vmem:[%s3145_s6 + $0x8] sm:$0xff]  ;;  %724 = vmatpush.msrb.mxu2 %v3583_v5 }
  0x9d   : > { %4640 = vst [vmem:[#allocation91_spill] sm:$0xff] %v3534_v29  ;;  %v306_v29 = vld [vmem:[#allocation7 + $0x88] sm:$0xff]  ;;  %793 = vmatpush.msrb.mxu3 %v3587_v22  ;;  %675 = vmatpush.msrb.mxu1 %v3230_v34 }
  0x9e   : > { %4641 = vst [vmem:[#allocation92_spill] sm:$0xff] %v3539_v2  ;;  %v803_v2 = vsub.f32 %v3526_v15, %v3559_v19 }
  0x9f   : > { %4642 = vst [vmem:[#allocation93_spill] sm:$0xff] %v3542_v24  ;;  %799 = vmatpush.msrb.mxu3 %v3599_v61  ;;  %677 = vmatpush.msrb.mxu1 %v3256_v45 }
  0xa0   : > { %4643 = vst [vmem:[#allocation94_spill] sm:$0xff] %v3549_v3  ;;  %v3603_v3 = vand.u32 4294901760, %v306_v29  ;;  %v3621_v10 = vand.u32 4294901760, %v803_v2  ;;  %v366_v2 = vsub.f32 %v323_v16, %v3605_v51 }
  0xa1   : > { %4644 = vst [vmem:[#allocation95_spill] sm:$0xff] %v3554_v36  ;;  %v809_v36 = vsub.f32 %v3542_v24, %v3575_v1  ;;  %679 = vmatpush.msrb.mxu1 %v3269_v50 }
  0xa2   : > { %4645 = vst [vmem:[#allocation96_spill] sm:$0xff] %v3559_v19  ;;  %805 = vmatpush.msrb.mxu3 %v3621_v10  ;;  %726 = vmatpush.msrb.mxu2 %v3603_v3 }
  0xa3   : > { %4646 = vst [vmem:[#allocation97_spill] sm:$0xff] %v3570_v49  ;;  %v286_v49 = vld [vmem:[%s3152_s27 + $0x8] sm:$0xff]  ;;  %v3633_v11 = vand.u32 4294901760, %v809_v36  ;;  %681 = vmatpush.msrb.mxu1 %v3285_v56  ;;  %534 = vmatmul.f32.gmra.mxu2 %v366_v2 }
  0xa4   : > { %4647 = vst [vmem:[#allocation98_spill] sm:$0xff] %v3575_v1  ;;  %v360_v1 = vsub.f32 %v3562_v35, %v359_v59  ;;  %v322_v18 = vmul.f32 %v286_v49, %v3616_v13  ;;  %v3654_v49 = vsub.f32 %v305_v9, %v3629_v4  ;;  %v827_v9 = vsub.f32 %v3613_v57, %v3645_v23 }
  0xa5   : > { %4648 = vst [vmem:[#allocation99_spill] sm:$0xff] %v3581_v41  ;;  %811 = vmatpush.msrb.mxu3 %v3633_v11  ;;  %728 = vmatpush.msrb.mxu2 %v3629_v4 }
  0xa6   : > { %4649 = vst [vmem:[#allocation100_spill] sm:$0xff] %v3587_v22  ;;  %v3637_v22 = vsub.f32 %v306_v29, %v3603_v3  ;;  %v361_v36 = vand.u32 4294901760, %v360_v1  ;;  %v821_v29 = vsub.f32 %v3595_v38, %v3627_v0  ;;  %v3665_v1 = vand.u32 4294901760, %v815_v17 }
  0xa7   : > { %4650 = vst [vmem:[#allocation101_spill] sm:$0xff] %v3595_v38  ;;  %v3685_v59 = vand.u32 4294901760, %v827_v9 }
  0xa8   : > { %4651 = vst [vmem:[#allocation102_spill] sm:$0xff] %v3599_v61  ;;  %v3659_v16 = vand.u32 4294901760, %v3637_v22  ;;  %v367_v61 = vand.u32 4294901760, %v366_v2  ;;  %362 = vmatmul.f32.vlgmr.msra.gmra.mxu0 %v361_v36  ;;  %v3671_v35 = vand.u32 4294901760, %v821_v29  ;;  %817 = vmatpush.msrb.mxu3 %v3665_v1 }
  0xa9   : > { %4652 = vst [vmem:[#allocation103_spill] sm:$0xff] %v3610_v63  ;;  %853 = vmatpush.msra.mxu0 %v3348_v48 }
  0xaa   : > { %4653 = vst [vmem:[#allocation104_spill] sm:$0xff] %v3613_v57  ;;  %v833_v17 = vsub.f32 %v3637_v22, %v3659_v16  ;;  %v368_v52 = vsub.f32 %v366_v2, %v367_v61  ;;  %823 = vmatpush.msrb.mxu3 %v3671_v35  ;;  %v3714_v2 = vld [vmem:[%s3152_s27 + $0x18] sm:$0xff] }
  0xab   : > { %4654 = vst [vmem:[#allocation105_spill] sm:$0xff] %v3621_v10  ;;  %v3661_v10 = vand.u32 4294901760, %v322_v18  ;;  %856 = vmatpush.msra.mxu0 %v3370_v7  ;;  %579 = vmatmul.f32.gmra.mxu3 %v367_v61  ;;  %v4668_v7 = vld [vmem:[#allocation67_spill] sm:$0xff] }
  0xac   : > { %4655 = vst [vmem:[#allocation106_spill] sm:$0xff] %v3627_v0  ;;  %v369_v29 = vand.u32 4294901760, %v368_v52  ;;  %829 = vmatpush.msrb.mxu3 %v3685_v59  ;;  %958 = vmatpush.msra.mxu2 %v4668_v7  ;;  %v4672_v7 = vld [vmem:[#allocation72_spill] sm:$0xff] }
  0xad   : > { %4656 = vst [vmem:[#allocation107_spill] sm:$0xff] %v3633_v11  ;;  %v3674_v11 = vand.u32 4294901760, %v3654_v49  ;;  %v3681_v40 = vsub.f32 %v322_v18, %v3661_v10  ;;  %v3695_v18 = vand.u32 4294901760, %v833_v17  ;;  %859 = vmatpush.msra.mxu0 %v3389_v6  ;;  %v3711_v17 = vld [vmem:[%s3145_s6 + $0x18] sm:$0xff] }
  0xae   : > { %4657 = vst [vmem:[#allocation108_spill] sm:$0xff] %v3637_v22  ;;  %v324_v61 = vmul.f32 %v3714_v2, %v3711_v17 }
  0xaf   : > { %4658 = vst [vmem:[#allocation109_spill] sm:$0xff] %v3645_v23  ;;  %v839_v36 = vsub.f32 %v3654_v49, %v3674_v11  ;;  %v4509_v9 = vand.u32 4294901760, %v3681_v40  ;;  %835 = vmatpush.msrb.mxu3 %v3695_v18  ;;  %862 = vmatpush.msra.mxu0 %v3411_v54 }
  0xb0   : > { %4659 = vst [vmem:[#allocation110_spill] sm:$0xff] %v3654_v49  ;;  %370 = vmatmul.f32.gmra.mxu0 %v369_v29 }
  0xb1   : > { %4660 = vst [vmem:[#allocation111_spill] sm:$0xff] %v3659_v16  ;;  %v3703_v48 = vand.u32 4294901760, %v839_v36  ;;  %v732_v52 = vsub.f32 %v3681_v40, %v4509_v9  ;;  %v4670_v36 = vld [vmem:[#allocation70_spill] sm:$0xff]  ;;  %v4671_v9 = vld [vmem:[#allocation55_spill] sm:$0xff]  ;;  %865 = vmatpush.msra.mxu0 %v3435_v26 }
  0xb2   : > { %4661 = vst [vmem:[#allocation112_spill] sm:$0xff] %v3665_v1  ;;  %962 = vmatpush.msra.mxu2 %v4670_v36  ;;  %v3731_v36 = vand.u32 4294901760, %v324_v61 }
  0xb3   : > { %4662 = vst [vmem:[#allocation113_spill] sm:$0xff] %v3671_v35  ;;  %v4666_v35 = vld [vmem:[#allocation48_spill] sm:$0xff]  ;;  %841 = vmatpush.msrb.mxu3 %v3703_v48  ;;  %v733_v29 = vand.u32 4294901760, %v732_v52  ;;  %868 = vmatpush.msra.mxu0 %v3453_v44 }
  0xb4   : > { %4663 = vst [vmem:[#allocation114_spill] sm:$0xff] %v3674_v11  ;;  %683 = vmatpush.msrb.mxu1 %v4666_v35  ;;  %966 = vmatpush.msra.mxu2 %v4672_v7  ;;  %v3742_v52 = vsub.f32 %v324_v61, %v3731_v36  ;;  %v4674_v61 = vld [vmem:[#allocation86_spill] sm:$0xff] }
  0xb5   : > { %4664 = vst [vmem:[#allocation115_spill] sm:$0xff] %v3685_v59  ;;  %v4669_v59 = vld [vmem:[#allocation52_spill] sm:$0xff]  ;;  %1029 = vmatpush.msra.mxu3 %v3313_v8  ;;  %734 = vmatmul.f32.vlgmr.msrb.gmra.mxu2 %v733_v29  ;;  %v4673_v29 = vld [vmem:[#allocation83_spill] sm:$0xff] }
  0xb6   : > { %4665 = vst [vmem:[#allocation116_spill] sm:$0xff] %v3695_v18  ;;  %685 = vmatpush.msrb.mxu1 %v4669_v59  ;;  %970 = vmatpush.msra.mxu2 %v3446_v39 }
  0xb7   : > { %4667 = vst [vmem:[#allocation48_spill] sm:$0xff] %v3714_v2  ;;  %1031 = vmatpush.msra.mxu3 %v3331_v32  ;;  %871 = vmatpush.msra.mxu0 %v3475_v46  ;;  %v4515_v2 = vand.u32 4294901760, %v3742_v52 }
  0xb8   : > { %687 = vmatpush.msrb.mxu1 %v4671_v9  ;;  %648 = vmatmul.f32.vlgmr.msrb.gmra.mxu0 %v3528_v27 }
  0xb9   : > { %1033 = vmatpush.msra.mxu3 %v3350_v53  ;;  %974 = vmatpush.msra.mxu2 %v3472_v55 }
  0xba   : > { %911 = vmatpush.msra.mxu1 %v3313_v8  ;;  %843 = vmatmul.f32.vlgmr.msrb.gmra.mxu3 %v3661_v10 }
  0xbb   : > { %1035 = vmatpush.msra.mxu3 %v3372_v12  ;;  %689 = vmatmul.f32.vlgmr.msrb.gmra.mxu1 %v3528_v27  ;;  %v4675_v27 = vld [vmem:[#allocation89_spill] sm:$0xff] }
  0xbc   : > { %913 = vmatpush.msra.mxu1 %v3331_v32  ;;  %874 = vmatpush.msra.mxu0 %v3493_v31 }
  0xbd   : > { %978 = vmatpush.msra.mxu2 %v4673_v29  ;;  %1037 = vmatpush.msra.mxu3 %v3400_v21  ;;  %v4676_v29 = vld [vmem:[#allocation92_spill] sm:$0xff] }
  0xbe   : > { %915 = vmatpush.msra.mxu1 %v3350_v53  ;;  %877 = vmatpush.msra.mxu0 %v3510_v60  ;;  %v740_v60 = vsub.f32 %v3742_v52, %v4515_v2  ;;  %v4677_v2 = vld [vmem:[#allocation98_spill] sm:$0xff] }
  0xbf   : > { %982 = vmatpush.msra.mxu2 %v4674_v61  ;;  %1039 = vmatpush.msra.mxu3 %v3419_v43 }
  0xc0   : > { %917 = vmatpush.msra.mxu1 %v3372_v12  ;;  %880 = vmatpush.msra.mxu0 %v3526_v15 }
  0xc1   : > { %986 = vmatpush.msra.mxu2 %v4675_v27  ;;  %1041 = vmatpush.msra.mxu3 %v3437_v37 }
  0xc2   : > { %919 = vmatpush.msra.mxu1 %v3400_v21  ;;  %883 = vmatpush.msra.mxu0 %v3542_v24  ;;  %v741_v24 = vand.u32 4294901760, %v740_v60  ;;  %v4680_v60 = vld [vmem:[#allocation15_spill] sm:$0xff] }
  0xc3   : > { %990 = vmatpush.msra.mxu2 %v4676_v29  ;;  %1043 = vmatpush.msra.mxu3 %v3455_v14  ;;  %v4678_v29 = vld [vmem:[#allocation84_spill] sm:$0xff] }
  0xc4   : > { %921 = vmatpush.msra.mxu1 %v3419_v43  ;;  %886 = vmatpush.msra.mxu0 %v3581_v41 }
  0xc5   : > { %994 = vmatpush.msra.mxu2 %v3559_v19  ;;  %1045 = vmatpush.msra.mxu3 %v3477_v47 }
  0xc6   : > { %923 = vmatpush.msra.mxu1 %v3437_v37  ;;  %652 = vmatmul.f32.gmra.mxu0 %v3605_v51 }
  0xc7   : > { %889 = vmatpush.msra.mxu0 %v3595_v38  ;;  %998 = vmatpush.msra.mxu2 %v4677_v2  ;;  %v4721_v2 = vld [vmem:[#allocation29_spill] sm:$0xff] }
  0xc8   : > { %925 = vmatpush.msra.mxu1 %v3455_v14  ;;  %1047 = vmatpush.msra.mxu3 %v4678_v29 }
  0xc9   : > { %892 = vmatpush.msra.mxu0 %v3613_v57  ;;  %1002 = vmatpush.msra.mxu2 %v3610_v63  ;;  %v4690_v63 = vld [vmem:[#allocation24_spill] sm:$0xff]  ;;  %v4719_v57 = vld [vmem:[#allocation63_spill] sm:$0xff] }
  0xca   : > { %927 = vmatpush.msra.mxu1 %v3477_v47  ;;  %1049 = vmatpush.msra.mxu3 %v3512_v20 }
  0xcb   : > { %742 = vmatmul.f32.gmra.mxu2 %v741_v24  ;;  %895 = vmatpush.msra.mxu0 %v3637_v22  ;;  %v4679_v24 = vld [vmem:[#allocation14_spill] sm:$0xff]  ;;  %v4688_v22 = vld [vmem:[#allocation35_spill] sm:$0xff] }
  0xcc   : > { %929 = vmatpush.msra.mxu1 %v4678_v29  ;;  %1006 = vmatpush.msra.mxu2 %v3627_v0  ;;  %v4686_v0 = vand.u32 4294901760, %v3681_v40 }
  0xcd   : > { %1051 = vmatpush.msra.mxu3 %v3546_v33  ;;  %898 = vmatpush.msra.mxu0 %v3654_v49  ;;  %v4684_v49 = vld [vmem:[#allocation21_spill] sm:$0xff] }
  0xce   : > { %931 = vmatpush.msra.mxu1 %v3512_v20  ;;  %847 = vmatmul.f32.gmra.mxu3 %v3731_v36 }
  0xcf   : > { %1010 = vmatpush.msra.mxu2 %v3645_v23  ;;  %1053 = vmatpush.msra.mxu3 %v3566_v62  ;;  %v4682_v23 = vld [vmem:[#allocation20_spill] sm:$0xff] }
  0xd0   : > { %933 = vmatpush.msra.mxu1 %v3546_v33  ;;  %901 = vmatmul.f32.vlgmr.msra.gmra.mxu0 %v3681_v40  ;;  %v4692_v40 = vld [vmem:[#allocation23_spill] sm:$0xff] }
  0xd1   : > { %693 = vmatmul.f32.gmra.mxu1 %v3605_v51  ;;  %1074 = vmatpush.msrb.mxu0 %v4679_v24  ;;  %v4681_v51 = vld [vmem:[#allocation16_spill] sm:$0xff] }
  0xd2   : > { %935 = vmatpush.msra.mxu1 %v3566_v62  ;;  %1014 = vmatpush.msra.mxu2 %v3659_v16  ;;  %v4683_v16 = vld [vmem:[#allocation17_spill] sm:$0xff] }
  0xd3   : > { %1055 = vmatpush.msra.mxu3 %v3583_v5  ;;  %1076 = vmatpush.msrb.mxu0 %v4680_v60 }
  0xd4   : > { %937 = vmatpush.msra.mxu1 %v3583_v5  ;;  %1018 = vmatpush.msra.mxu2 %v3674_v11  ;;  %v4685_v11 = vld [vmem:[#allocation18_spill] sm:$0xff] }
  0xd5   : > { %1057 = vmatpush.msra.mxu3 %v3603_v3  ;;  %1020 = vmatmul.f32.vlgmr.msra.gmra.mxu2 %v3661_v10 }
  0xd6   : > { %1078 = vmatpush.msrb.mxu0 %v4681_v51  ;;  %1229 = vmatpush.msrb.mxu2 %v4682_v23  ;;  %v4687_v23 = vld [vmem:[#allocation22_spill] sm:$0xff] }
  0xd7   : > { %939 = vmatpush.msra.mxu1 %v3603_v3  ;;  %1059 = vmatpush.msra.mxu3 %v3629_v4 }
  0xd8   : > { %1061 = vmatmul.f32.vlgmr.msra.gmra.mxu3 %v3661_v10  ;;  %1080 = vmatpush.msrb.mxu0 %v4683_v16  ;;  %v4689_v10 = vld [vmem:[#allocation19_spill] sm:$0xff] }
  0xd9   : > { %1232 = vmatpush.msrb.mxu2 %v4684_v49  ;;  %1287 = vmatpush.msrb.mxu3 %v4679_v24  ;;  %v4691_v49 = vld [vmem:[#allocation36_spill] sm:$0xff] }
  0xda   : > { %941 = vmatpush.msra.mxu1 %v3629_v4  ;;  %1082 = vmatpush.msrb.mxu0 %v4685_v11 }
  0xdb   : > { %945 = vmatmul.f32.vlgmr.msra.gmra.mxu1 %v4686_v0  ;;  %1235 = vmatpush.msrb.mxu2 %v4687_v23  ;;  %v4693_v0 = vld [vmem:[#allocation39_spill] sm:$0xff]  ;;  %v4694_v23 = vld [vmem:[#allocation25_spill] sm:$0xff] }
  0xdc   : > { %1127 = vmatpush.msrb.mxu1 %v4688_v22  ;;  %1289 = vmatpush.msrb.mxu3 %v4680_v60  ;;  %v4697_v22 = vand.u32 4294901760, %v3742_v52 }
  0xdd   : > { %1084 = vmatpush.msrb.mxu0 %v4689_v10  ;;  %1238 = vmatpush.msrb.mxu2 %v4690_v63  ;;  %v4695_v63 = vld [vmem:[#allocation41_spill] sm:$0xff] }
  0xde   : > { %1133 = vmatpush.msrb.mxu1 %v4691_v49  ;;  %1291 = vmatpush.msrb.mxu3 %v4681_v51  ;;  %v4696_v49 = vld [vmem:[#allocation26_spill] sm:$0xff] }
  0xdf   : > { %906 = vmatmul.f32.gmra.mxu0 %v3742_v52  ;;  %1024 = vmatmul.f32.gmra.mxu2 %v3731_v36  ;;  %v4702_v52 = vld [vmem:[#allocation51_spill] sm:$0xff] }
  0xe0   : > { %1086 = vmatpush.msrb.mxu0 %v4692_v40  ;;  %1139 = vmatpush.msrb.mxu1 %v4693_v0  ;;  %v4698_v0 = vld [vmem:[#allocation44_spill] sm:$0xff] }
  0xe1   : > { %1241 = vmatpush.msrb.mxu2 %v4694_v23  ;;  %1293 = vmatpush.msrb.mxu3 %v4683_v16  ;;  %v4699_v23 = vld [vmem:[#allocation32_spill] sm:$0xff] }
  0xe2   : > { %1065 = vmatmul.f32.gmra.mxu3 %v3731_v36  ;;  %1088 = vmatpush.msrb.mxu0 %v3207_v25  ;;  %v4700_v36 = vld [vmem:[#allocation47_spill] sm:$0xff] }
  0xe3   : > { %1145 = vmatpush.msrb.mxu1 %v4695_v63  ;;  %1244 = vmatpush.msrb.mxu2 %v4696_v49  ;;  %v4701_v63 = vld [vmem:[#allocation37_spill] sm:$0xff]  ;;  %v4716_v49 = vld [vmem:[#allocation62_spill] sm:$0xff] }
  0xe4   : > { %1295 = vmatpush.msrb.mxu3 %v4685_v11  ;;  %951 = vmatmul.f32.gmra.mxu1 %v4697_v22  ;;  %v4703_v22 = vld [vmem:[#allocation40_spill] sm:$0xff] }
  0xe5   : > { %1090 = vmatpush.msrb.mxu0 %v3213_v28  ;;  %1151 = vmatpush.msrb.mxu1 %v4698_v0  ;;  %v4705_v0 = vld [vmem:[#allocation43_spill] sm:$0xff] }
  0xe6   : > { %1247 = vmatpush.msrb.mxu2 %v4699_v23  ;;  %1297 = vmatpush.msrb.mxu3 %v4689_v10  ;;  %v4704_v23 = vld [vmem:[#allocation56_spill] sm:$0xff] }
  0xe7   : > { %1092 = vmatpush.msrb.mxu0 %v3230_v34  ;;  %1157 = vmatpush.msrb.mxu1 %v4700_v36  ;;  %v4707_v36 = vld [vmem:[#allocation46_spill] sm:$0xff] }
  0xe8   : > { %1250 = vmatpush.msrb.mxu2 %v4701_v63  ;;  %1299 = vmatpush.msrb.mxu3 %v4692_v40  ;;  %v4706_v63 = vld [vmem:[#allocation60_spill] sm:$0xff] }
  0xe9   : > { %1094 = vmatpush.msrb.mxu0 %v3256_v45  ;;  %1163 = vmatpush.msrb.mxu1 %v4702_v52  ;;  %v4709_v52 = vld [vmem:[#allocation50_spill] sm:$0xff] }
  0xea   : > { %1253 = vmatpush.msrb.mxu2 %v4703_v22  ;;  %1301 = vmatpush.msrb.mxu3 %v3207_v25  ;;  %v4708_v22 = vld [vmem:[#allocation65_spill] sm:$0xff] }
  0xeb   : > { %1096 = vmatpush.msrb.mxu0 %v3269_v50  ;;  %1169 = vmatpush.msrb.mxu1 %v4704_v23  ;;  %v4711_v23 = vld [vmem:[#allocation54_spill] sm:$0xff] }
  0xec   : > { %1256 = vmatpush.msrb.mxu2 %v4705_v0  ;;  %1303 = vmatpush.msrb.mxu3 %v3213_v28  ;;  %v4710_v0 = vld [vmem:[#allocation68_spill] sm:$0xff] }
  0xed   : > { %1098 = vmatpush.msrb.mxu0 %v3285_v56  ;;  %1175 = vmatpush.msrb.mxu1 %v4706_v63  ;;  %v4713_v63 = vld [vmem:[#allocation58_spill] sm:$0xff] }
  0xee   : > { %1259 = vmatpush.msrb.mxu2 %v4707_v36  ;;  %1305 = vmatpush.msrb.mxu3 %v3230_v34  ;;  %v4712_v36 = vld [vmem:[#allocation71_spill] sm:$0xff] }
  0xef   : > { %1100 = vmatpush.msrb.mxu0 %v4666_v35  ;;  %1181 = vmatpush.msrb.mxu1 %v4708_v22  ;;  %v4714_v22 = vld [vmem:[#allocation27_spill] sm:$0xff] }
  0xf0   : > { %1262 = vmatpush.msrb.mxu2 %v4709_v52  ;;  %1307 = vmatpush.msrb.mxu3 %v3256_v45  ;;  %v4715_v52 = vld [vmem:[#allocation73_spill] sm:$0xff] }
  0xf1   : > { %1102 = vmatpush.msrb.mxu0 %v4669_v59  ;;  %1187 = vmatpush.msrb.mxu1 %v4710_v0  ;;  %v4717_v0 = vld [vmem:[#allocation28_spill] sm:$0xff] }
  0xf2   : > { %1265 = vmatpush.msrb.mxu2 %v4711_v23  ;;  %1309 = vmatpush.msrb.mxu3 %v3269_v50  ;;  %v4718_v23 = vld [vmem:[#allocation75_spill] sm:$0xff] }
  0xf3   : > { %1104 = vmatpush.msrb.mxu0 %v4671_v9  ;;  %1193 = vmatpush.msrb.mxu1 %v4712_v36  ;;  %v4720_v36 = vld [vmem:[#allocation78_spill] sm:$0xff] }
  0xf4   : > { %1268 = vmatpush.msrb.mxu2 %v4713_v63  ;;  %1311 = vmatpush.msrb.mxu3 %v3285_v56  ;;  %v1069_v63 = vmul.f32 %v4720_v36, %v4720_v36  ;;  %v4727_v36 = vld [vmem:[#allocation82_spill] sm:$0xff] }
  0xf5   : > { %1334 = vmatpush.msra.mxu0 %v4714_v22  ;;  %1199 = vmatpush.msrb.mxu1 %v4715_v52  ;;  %v4722_v52 = vld [vmem:[#allocation79_spill] sm:$0xff]  ;;  %v4726_v22 = vld [vmem:[#allocation33_spill] sm:$0xff] }
  0xf6   : > { %1271 = vmatpush.msrb.mxu2 %v4716_v49  ;;  %1313 = vmatpush.msrb.mxu3 %v4666_v35  ;;  %v4723_v49 = vld [vmem:[#allocation31_spill] sm:$0xff] }
  0xf7   : > { %1338 = vmatpush.msra.mxu0 %v4717_v0  ;;  %1205 = vmatpush.msrb.mxu1 %v4718_v23  ;;  %v4724_v23 = vld [vmem:[#allocation77_spill] sm:$0xff]  ;;  %v3881_v0 = vand.u32 4294901760, %v1069_v63 }
  0xf8   : > { %1274 = vmatpush.msrb.mxu2 %v4719_v57  ;;  %1315 = vmatpush.msrb.mxu3 %v4669_v59  ;;  %v4725_v57 = vld [vmem:[#allocation81_spill] sm:$0xff] }
  0xf9   : > { %1342 = vmatpush.msra.mxu0 %v4721_v2  ;;  %1211 = vmatpush.msrb.mxu1 %v4722_v52  ;;  %v4728_v52 = vld [vmem:[#allocation34_spill] sm:$0xff] }
  0xfa   : > { %1446 = vmatpush.msra.mxu2 %v3313_v8  ;;  %1317 = vmatpush.msrb.mxu3 %v4671_v9  ;;  %v4732_v2 = vld [vmem:[#allocation42_spill] sm:$0xff] }
  0xfb   : > { %1346 = vmatpush.msra.mxu0 %v4723_v49  ;;  %1217 = vmatpush.msrb.mxu1 %v4725_v57  ;;  %v4729_v49 = vld [vmem:[#allocation85_spill] sm:$0xff]  ;;  %v4731_v57 = vld [vmem:[#allocation88_spill] sm:$0xff] }
  0xfc   : > { %1448 = vmatpush.msra.mxu2 %v3331_v32  ;;  %1499 = vmatpush.msra.mxu3 %v4724_v23  ;;  %v4730_v23 = vld [vmem:[#allocation38_spill] sm:$0xff] }
  0xfd   : > { %1350 = vmatpush.msra.mxu0 %v4726_v22  ;;  %1405 = vmatpush.msra.mxu1 %v4679_v24  ;;  %v1106_v22 = vsub.f32 %v1069_v63, %v3881_v0 }
  0xfe   : > { %1450 = vmatpush.msra.mxu2 %v3350_v53  ;;  %1505 = vmatpush.msra.mxu3 %v4727_v36 }
  0xff   : > { %1354 = vmatpush.msra.mxu0 %v4728_v52  ;;  %1407 = vmatpush.msra.mxu1 %v4680_v60  ;;  %v4733_v52 = vld [vmem:[#allocation94_spill] sm:$0xff]  ;;  %v1107_v63 = vand.u32 4294901760, %v1106_v22 }
 0x100   : > { %1452 = vmatpush.msra.mxu2 %v3372_v12  ;;  %1511 = vmatpush.msra.mxu3 %v4729_v49  ;;  %v1071_v36 = vmul.f32 %v4733_v52, %v4733_v52  ;;  %v4734_v49 = vld [vmem:[#allocation91_spill] sm:$0xff]  ;;  %v4738_v52 = vld [vmem:[#allocation97_spill] sm:$0xff] }
 0x101   : > { %1358 = vmatpush.msra.mxu0 %v4730_v23  ;;  %1409 = vmatpush.msra.mxu1 %v4681_v51  ;;  %v4735_v23 = vld [vmem:[#allocation45_spill] sm:$0xff]  ;;  %v4736_v51 = vld [vmem:[#allocation95_spill] sm:$0xff] }
 0x102   : > { %1454 = vmatpush.msra.mxu2 %v3400_v21  ;;  %1517 = vmatpush.msra.mxu3 %v4731_v57  ;;  %v4737_v57 = vld [vmem:[#allocation49_spill] sm:$0xff] }
 0x103   : > { %1362 = vmatpush.msra.mxu0 %v4732_v2  ;;  %1411 = vmatpush.msra.mxu1 %v4683_v16  ;;  %v3908_v2 = vand.u32 4294901760, %v1071_v36 }
 0x104   : > { %1456 = vmatpush.msra.mxu2 %v3419_v43  ;;  %1523 = vmatpush.msra.mxu3 %v4734_v49  ;;  %v4739_v49 = vld [vmem:[#allocation53_spill] sm:$0xff] }
 0x105   : > { %1366 = vmatpush.msra.mxu0 %v4735_v23  ;;  %1413 = vmatpush.msra.mxu1 %v4685_v11  ;;  %v1108_v23 = vsub.f32 %v1106_v22, %v1107_v63  ;;  %v4740_v11 = vld [vmem:[#allocation100_spill] sm:$0xff] }
 0x106   : > { %1458 = vmatpush.msra.mxu2 %v3437_v37  ;;  %1529 = vmatpush.msra.mxu3 %v4736_v51  ;;  %v1114_v51 = vsub.f32 %v1071_v36, %v3908_v2  ;;  %v4745_v36 = vld [vmem:[#allocation107_spill] sm:$0xff] }
 0x107   : > { %1370 = vmatpush.msra.mxu0 %v4737_v57  ;;  %1415 = vmatpush.msra.mxu1 %v4689_v10  ;;  %v1070_v57 = vmul.f32 %v3616_v13, %v3616_v13 }
 0x108   : > { %1460 = vmatpush.msra.mxu2 %v3455_v14  ;;  %1535 = vmatpush.msra.mxu3 %v4738_v52  ;;  %v4741_v52 = vld [vmem:[#allocation102_spill] sm:$0xff] }
 0x109   : > { %1374 = vmatpush.msra.mxu0 %v4739_v49  ;;  %1417 = vmatpush.msra.mxu1 %v4692_v40  ;;  %v4742_v49 = vld [vmem:[#allocation61_spill] sm:$0xff]  ;;  %v1109_v40 = vand.u32 4294901760, %v1108_v23  ;;  %v3927_v13 = vand.u32 4294901760, %v1070_v57 }
 0x10a   : > { %1462 = vmatpush.msra.mxu2 %v3477_v47  ;;  %1541 = vmatpush.msra.mxu3 %v4740_v11  ;;  %v4743_v11 = vld [vmem:[#allocation105_spill] sm:$0xff] }
 0x10b   : > { %1378 = vmatpush.msra.mxu0 %v3340_v42  ;;  %1419 = vmatpush.msra.mxu1 %v3207_v25  ;;  %v4744_v42 = vld [vmem:[#allocation66_spill] sm:$0xff]  ;;  %v1115_v25 = vand.u32 4294901760, %v1114_v51 }
 0x10c   : > { %1464 = vmatpush.msra.mxu2 %v4678_v29  ;;  %1547 = vmatpush.msra.mxu3 %v4741_v52 }
 0x10d   : > { %1382 = vmatpush.msra.mxu0 %v4742_v49  ;;  %1421 = vmatpush.msra.mxu1 %v3213_v28  ;;  %v1116_v23 = vsub.f32 %v1114_v51, %v1115_v25 }
 0x10e   : > { %1466 = vmatpush.msra.mxu2 %v3512_v20  ;;  %1553 = vmatpush.msra.mxu3 %v4743_v11 }
 0x10f   : > { %1277 = vmatmul.f32.vlgmr.msrb.gmra.mxu2 %v1106_v22  ;;  %1386 = vmatpush.msra.mxu0 %v4744_v42  ;;  %v3937_v22 = vsub.f32 %v1070_v57, %v3927_v13 }
 0x110   : > { %1423 = vmatpush.msra.mxu1 %v3230_v34  ;;  %1468 = vmatpush.msra.mxu2 %v3546_v33 }
 0x111   : > { %1559 = vmatpush.msra.mxu3 %v4745_v36  ;;  %1110 = vmatmul.f32.vlgmr.msrb.gmra.mxu0 %v1109_v40  ;;  %v4746_v40 = vld [vmem:[#allocation113_spill] sm:$0xff]  ;;  %v4541_v57 = vand.u32 4294901760, %v3937_v22  ;;  %v4749_v36 = vld [vmem:[#allocation64_spill] sm:$0xff] }
 0x112   : > { %1321 = vmatmul.f32.vlgmr.msrb.gmra.mxu3 %v1107_v63  ;;  %1390 = vmatpush.msra.mxu0 %v3398_v58  ;;  %v4747_v63 = vld [vmem:[#allocation59_spill] sm:$0xff]  ;;  %v1117_v58 = vand.u32 4294901760, %v1116_v23 }
 0x113   : > { %1425 = vmatpush.msra.mxu1 %v3256_v45  ;;  %1470 = vmatpush.msra.mxu2 %v3566_v62  ;;  %v1480_v23 = vsub.f32 %v3937_v22, %v4541_v57 }
 0x114   : > { %1565 = vmatpush.msra.mxu3 %v3665_v1  ;;  %1219 = vmatmul.f32.vlgmr.msrb.gmra.mxu1 %v3881_v0  ;;  %v4748_v1 = vld [vmem:[#allocation115_spill] sm:$0xff] }
 0x115   : > { %1394 = vmatpush.msra.mxu0 %v3405_v30  ;;  %1427 = vmatpush.msra.mxu1 %v3269_v50 }
 0x116   : > { %1472 = vmatpush.msra.mxu2 %v3583_v5  ;;  %1571 = vmatpush.msra.mxu3 %v4746_v40 }
 0x117   : > { %1601 = vmatpush.msrb.mxu0 %v4747_v63  ;;  %1429 = vmatpush.msra.mxu1 %v3285_v56  ;;  %v4750_v63 = vld [vmem:[#allocation67_spill] sm:$0xff] }
 0x118   : > { %1474 = vmatpush.msra.mxu2 %v3603_v3  ;;  %1577 = vmatpush.msra.mxu3 %v4748_v1 }
 0x119   : > { %1282 = vmatmul.f32.gmra.mxu2 %v1114_v51  ;;  %1604 = vmatpush.msrb.mxu0 %v4749_v36  ;;  %v4751_v51 = vld [vmem:[#allocation70_spill] sm:$0xff] }
 0x11a   : > { %1431 = vmatpush.msra.mxu1 %v4666_v35  ;;  %1476 = vmatpush.msra.mxu2 %v3629_v4 }
 0x11b   : > { %1583 = vmatpush.msra.mxu3 %v3695_v18  ;;  %1118 = vmatmul.f32.gmra.mxu0 %v1117_v58  ;;  %v1481_v58 = vand.u32 4294901760, %v1480_v23  ;;  %v1072_v18 = vmul.f32 %v3711_v17, %v3711_v17  ;;  %v472_v17 = vpop.f32.mrf.mxu1 }
 0x11c   : > { %1327 = vmatmul.f32.gmra.mxu3 %v1115_v25  ;;  %1607 = vmatpush.msrb.mxu0 %v3389_v6 }
 0x11d   : > { %1706 = vmatpush.msrb.mxu2 %v4750_v63  ;;  %1433 = vmatpush.msra.mxu1 %v4669_v59  ;;  %v3973_v23 = vand.u32 4294901760, %v1072_v18 }
 0x11e   : > { %1589 = vmatpush.msra.mxu3 %v3703_v48  ;;  %1223 = vmatmul.f32.gmra.mxu1 %v3908_v2 }
 0x11f   : > { %1610 = vmatpush.msrb.mxu0 %v3411_v54  ;;  %1710 = vmatpush.msrb.mxu2 %v4751_v51 }
 0x120   : > { %1777 = vmatpush.msrb.mxu3 %v3313_v8  ;;  %1435 = vmatpush.msra.mxu1 %v4671_v9 }
 0x121   : > { %1613 = vmatpush.msrb.mxu0 %v3435_v26  ;;  %1714 = vmatpush.msrb.mxu2 %v4672_v7  ;;  %v530_v7 = vpop.f32.mrf.mxu2 }
 0x122   : > { %1659 = vmatpush.msrb.mxu1 %v3313_v8  ;;  %1779 = vmatpush.msrb.mxu3 %v3331_v32 }
 0x123   : > { %1482 = vmatmul.f32.vlgmr.msra.gmra.mxu2 %v1481_v58  ;;  %1616 = vmatpush.msrb.mxu0 %v3453_v44  ;;  %v3984_v58 = vsub.f32 %v1072_v18, %v3973_v23  ;;  %v574_v44 = vpop.f32.mrf.mxu3 }
 0x124   : > { %1661 = vmatpush.msrb.mxu1 %v3331_v32  ;;  %1718 = vmatpush.msrb.mxu2 %v3446_v39 }
 0x125   : > { %v363_v25 = vpop.f32.mrf.mxu0  ;;  %1781 = vmatpush.msrb.mxu3 %v3350_v53  ;;  %1396 = vmatmul.f32.vlgmr.msra.gmra.mxu0 %v3881_v0  ;;  %v4548_v18 = vand.u32 4294901760, %v3984_v58 }
 0x126   : > { %1591 = vmatmul.f32.vlgmr.msra.gmra.mxu3 %v3927_v13  ;;  %1619 = vmatpush.msrb.mxu0 %v3475_v46  ;;  %v473_v57 = vadd.f32 %v472_v17, %v363_v25  ;;  %v4752_v46 = vld [vmem:[#allocation83_spill] sm:$0xff] }
 0x127   : > { %1663 = vmatpush.msrb.mxu1 %v3350_v53  ;;  %1722 = vmatpush.msrb.mxu2 %v3472_v55  ;;  %v4753_v17 = vld [vmem:[#allocation87_spill] sm:$0xff] }
 0x128   : > { %1783 = vmatpush.msrb.mxu3 %v3372_v12  ;;  %1437 = vmatmul.f32.vlgmr.msra.gmra.mxu1 %v3881_v0  ;;  %v531_v39 = vadd.f32 %v530_v7, %v473_v57  ;;  %v476_v0 = vpop.f32.mrf.mxu1  ;;  %v4755_v57 = vld [vmem:[#allocation92_spill] sm:$0xff] }
 0x129   : > { %1622 = vmatpush.msrb.mxu0 %v3493_v31  ;;  %1665 = vmatpush.msrb.mxu1 %v3372_v12 }
 0x12a   : > { %1726 = vmatpush.msrb.mxu2 %v4752_v46  ;;  %1785 = vmatpush.msrb.mxu3 %v3400_v21  ;;  %v575_v25 = vadd.f32 %v574_v44, %v531_v39  ;;  %v4754_v44 = vld [vmem:[#allocation93_spill] sm:$0xff]  ;;  %v1488_v39 = vsub.f32 %v3984_v58, %v4548_v18 }
 0x12b   : > { %1625 = vmatpush.msrb.mxu0 %v4753_v17  ;;  %1667 = vmatpush.msrb.mxu1 %v3400_v21  ;;  %v4782_v17 = vld [vmem:[#allocation32_spill] sm:$0xff] }
 0x12c   : > { %1730 = vmatpush.msrb.mxu2 %v4674_v61  ;;  %1787 = vmatpush.msrb.mxu3 %v3419_v43  ;;  %v535_v61 = vpop.f32.mrf.mxu2  ;;  %v1489_v18 = vand.u32 4294901760, %v1488_v39  ;;  %v4759_v39 = vld [vmem:[#allocation108_spill] sm:$0xff] }
 0x12d   : > { %v371_v7 = vpop.f32.mrf.mxu0  ;;  %1628 = vmatpush.msrb.mxu0 %v3526_v15  ;;  %1669 = vmatpush.msrb.mxu1 %v3419_v43 }
 0x12e   : > { %1734 = vmatpush.msrb.mxu2 %v4675_v27  ;;  %1789 = vmatpush.msrb.mxu3 %v3437_v37  ;;  %v477_v15 = vadd.f32 %v476_v0, %v371_v7  ;;  %v580_v27 = vpop.f32.mrf.mxu3  ;;  %v4757_v0 = vld [vmem:[#allocation104_spill] sm:$0xff] }
 0x12f   : > { %1631 = vmatpush.msrb.mxu0 %v4754_v44  ;;  %1671 = vmatpush.msrb.mxu1 %v3437_v37 }
 0x130   : > { %1738 = vmatpush.msrb.mxu2 %v4755_v57  ;;  %1791 = vmatpush.msrb.mxu3 %v3455_v14  ;;  %v536_v44 = vadd.f32 %v535_v61, %v477_v15  ;;  %v4756_v57 = vld [vmem:[#allocation98_spill] sm:$0xff] }
 0x131   : > { %1634 = vmatpush.msrb.mxu0 %v3581_v41  ;;  %1673 = vmatpush.msrb.mxu1 %v3455_v14  ;;  %v4781_v41 = vld [vmem:[#allocation44_spill] sm:$0xff] }
 0x132   : > { %1742 = vmatpush.msrb.mxu2 %v3559_v19  ;;  %1793 = vmatpush.msrb.mxu3 %v3477_v47  ;;  %v581_v7 = vadd.f32 %v580_v27, %v536_v44  ;;  %v4758_v19 = vld [vmem:[#allocation103_spill] sm:$0xff]  ;;  %v4761_v44 = vld [vmem:[#allocation110_spill] sm:$0xff] }
 0x133   : > { %1400 = vmatmul.f32.gmra.mxu0 %v3908_v2  ;;  %1675 = vmatpush.msrb.mxu1 %v3477_v47 }
 0x134   : > { %1637 = vmatpush.msrb.mxu0 %v3595_v38  ;;  %1746 = vmatpush.msrb.mxu2 %v4756_v57  ;;  %v4760_v38 = vld [vmem:[#allocation106_spill] sm:$0xff]  ;;  %v4762_v57 = vld [vmem:[#allocation109_spill] sm:$0xff] }
 0x135   : > { %1795 = vmatpush.msrb.mxu3 %v4678_v29  ;;  %1677 = vmatpush.msrb.mxu1 %v4678_v29  ;;  %v649_v15 = vpop.f32.mrf.mxu0 }
 0x136   : > { %1640 = vmatpush.msrb.mxu0 %v4757_v0  ;;  %1750 = vmatpush.msrb.mxu2 %v4758_v19  ;;  %v650_v61 = vadd.f32 %v649_v15, %v575_v25  ;;  %v4763_v15 = vld [vmem:[#allocation111_spill] sm:$0xff] }
 0x137   : > { %1797 = vmatpush.msrb.mxu3 %v3512_v20  ;;  %1490 = vmatmul.f32.gmra.mxu2 %v1489_v18 }
 0x138   : > { %1643 = vmatpush.msrb.mxu0 %v4759_v39  ;;  %1679 = vmatpush.msrb.mxu1 %v3512_v20  ;;  %v690_v27 = vpop.f32.mrf.mxu1  ;;  %v735_v19 = vpop.f32.mrf.mxu2 }
 0x139   : > { %1754 = vmatpush.msrb.mxu2 %v4760_v38  ;;  %1799 = vmatpush.msrb.mxu3 %v3546_v33  ;;  %v691_v0 = vadd.f32 %v690_v27, %v650_v61  ;;  %v4764_v27 = vld [vmem:[#allocation114_spill] sm:$0xff] }
 0x13a   : > { %1595 = vmatmul.f32.gmra.mxu3 %v3973_v23  ;;  %1646 = vmatpush.msrb.mxu0 %v4761_v44  ;;  %v4778_v44 = vld [vmem:[#allocation41_spill] sm:$0xff]  ;;  %v4779_v38 = vld [vmem:[#allocation26_spill] sm:$0xff] }
 0x13b   : > { %1681 = vmatpush.msrb.mxu1 %v3546_v33  ;;  %1758 = vmatpush.msrb.mxu2 %v4762_v57  ;;  %v736_v25 = vadd.f32 %v735_v19, %v691_v0  ;;  %v4765_v19 = vld [vmem:[#allocation16_spill] sm:$0xff]  ;;  %v4771_v57 = vld [vmem:[#allocation35_spill] sm:$0xff] }
 0x13c   : > { %1801 = vmatpush.msrb.mxu3 %v3566_v62  ;;  %1441 = vmatmul.f32.gmra.mxu1 %v3908_v2  ;;  %v4766_v2 = vld [vmem:[#allocation20_spill] sm:$0xff] }
 0x13d   : > { %1649 = vmatmul.f32.vlgmr.msrb.gmra.mxu0 %v3937_v22  ;;  %1683 = vmatpush.msrb.mxu1 %v3566_v62  ;;  %v844_v18 = vpop.f32.mrf.mxu3 }
 0x13e   : > { %1822 = vmatpush.msra.mxu0 %v4679_v24  ;;  %1762 = vmatpush.msrb.mxu2 %v4763_v15  ;;  %v845_v61 = vadd.f32 %v844_v18, %v736_v25  ;;  %v4767_v25 = vld [vmem:[#allocation21_spill] sm:$0xff]  ;;  %v4770_v15 = vld [vmem:[#allocation22_spill] sm:$0xff] }
 0x13f   : > { %1803 = vmatpush.msrb.mxu3 %v3583_v5  ;;  %1685 = vmatpush.msrb.mxu1 %v3583_v5 }
 0x140   : > { %1824 = vmatpush.msra.mxu0 %v4680_v60  ;;  %1766 = vmatpush.msrb.mxu2 %v4764_v27  ;;  %v4768_v27 = vld [vmem:[#allocation18_spill] sm:$0xff] }
 0x141   : > { %1805 = vmatpush.msrb.mxu3 %v3603_v3  ;;  %1768 = vmatmul.f32.vlgmr.msrb.gmra.mxu2 %v3927_v13 }
 0x142   : > { %1826 = vmatpush.msra.mxu0 %v4765_v19  ;;  %1977 = vmatpush.msra.mxu2 %v4766_v2  ;;  %v4769_v2 = vand.u32 4294901760, %v3937_v22  ;;  %v4774_v22 = vld [vmem:[#allocation23_spill] sm:$0xff] }
 0x143   : > { %1687 = vmatpush.msrb.mxu1 %v3603_v3  ;;  %1807 = vmatpush.msrb.mxu3 %v3629_v4  ;;  %v653_v0 = vpop.f32.mrf.mxu0 }
 0x144   : > { %1809 = vmatmul.f32.vlgmr.msrb.gmra.mxu3 %v3927_v13  ;;  %1828 = vmatpush.msra.mxu0 %v4683_v16  ;;  %v654_v18 = vadd.f32 %v653_v0, %v581_v7  ;;  %v4772_v13 = vld [vmem:[#allocation24_spill] sm:$0xff]  ;;  %v4775_v7 = vld [vmem:[#allocation39_spill] sm:$0xff]  ;;  %v4777_v0 = vld [vmem:[#allocation30_spill] sm:$0xff] }
 0x145   : > { %1980 = vmatpush.msra.mxu2 %v4767_v25  ;;  %2035 = vmatpush.msra.mxu3 %v4679_v24  ;;  %v4773_v25 = vld [vmem:[#allocation36_spill] sm:$0xff] }
 0x146   : > { %1689 = vmatpush.msrb.mxu1 %v3629_v4  ;;  %1830 = vmatpush.msra.mxu0 %v4768_v27 }
 0x147   : > { %1693 = vmatmul.f32.vlgmr.msrb.gmra.mxu1 %v4769_v2  ;;  %1983 = vmatpush.msra.mxu2 %v4770_v15  ;;  %v4776_v15 = vld [vmem:[#allocation25_spill] sm:$0xff] }
 0x148   : > { %1875 = vmatpush.msra.mxu1 %v4771_v57  ;;  %2037 = vmatpush.msra.mxu3 %v4680_v60 }
 0x149   : > { %1832 = vmatpush.msra.mxu0 %v4689_v10  ;;  %1986 = vmatpush.msra.mxu2 %v4772_v13 }
 0x14a   : > { %1881 = vmatpush.msra.mxu1 %v4773_v25  ;;  %2039 = vmatpush.msra.mxu3 %v4765_v19 }
 0x14b   : > { %1654 = vmatmul.f32.gmra.mxu0 %v3984_v58  ;;  %1772 = vmatmul.f32.gmra.mxu2 %v3973_v23 }
 0x14c   : > { %1834 = vmatpush.msra.mxu0 %v4774_v22  ;;  %1887 = vmatpush.msra.mxu1 %v4775_v7  ;;  %v4780_v7 = vand.u32 4294901760, %v3984_v58  ;;  %v4785_v58 = vld [vmem:[#allocation51_spill] sm:$0xff] }
 0x14d   : > { %1989 = vmatpush.msra.mxu2 %v4776_v15  ;;  %2041 = vmatpush.msra.mxu3 %v4683_v16  ;;  %v902_v13 = vpop.f32.mrf.mxu0 }
 0x14e   : > { %v694_v57 = vpop.f32.mrf.mxu1  ;;  %1813 = vmatmul.f32.gmra.mxu3 %v3973_v23  ;;  %1836 = vmatpush.msra.mxu0 %v4777_v0  ;;  %v743_v25 = vpop.f32.mrf.mxu2  ;;  %v903_v39 = vadd.f32 %v902_v13, %v845_v61  ;;  %v4786_v61 = vld [vmem:[#allocation40_spill] sm:$0xff] }
 0x14f   : > { %v695_v2 = vadd.f32 %v694_v57, %v654_v18  ;;  %1893 = vmatpush.msra.mxu1 %v4778_v44  ;;  %1992 = vmatpush.msra.mxu2 %v4779_v38  ;;  %v4783_v38 = vld [vmem:[#allocation47_spill] sm:$0xff]  ;;  %v4784_v44 = vld [vmem:[#allocation37_spill] sm:$0xff]  ;;  %v4789_v13 = vld [vmem:[#allocation60_spill] sm:$0xff] }
 0x150   : > { %2043 = vmatpush.msra.mxu3 %v4768_v27  ;;  %1699 = vmatmul.f32.gmra.mxu1 %v4780_v7  ;;  %v4790_v7 = vld [vmem:[#allocation46_spill] sm:$0xff] }
 0x151   : > { %v744_v15 = vadd.f32 %v743_v25, %v695_v2  ;;  %1838 = vmatpush.msra.mxu0 %v3213_v28  ;;  %1899 = vmatpush.msra.mxu1 %v4781_v41  ;;  %v848_v23 = vpop.f32.mrf.mxu3  ;;  %v4787_v41 = vld [vmem:[#allocation56_spill] sm:$0xff] }
 0x152   : > { %1995 = vmatpush.msra.mxu2 %v4782_v17  ;;  %2045 = vmatpush.msra.mxu3 %v4689_v10  ;;  %v4788_v17 = vld [vmem:[#allocation43_spill] sm:$0xff] }
 0x153   : > { %v849_v18 = vadd.f32 %v848_v23, %v744_v15  ;;  %1840 = vmatpush.msra.mxu0 %v3230_v34  ;;  %1905 = vmatpush.msra.mxu1 %v4783_v38  ;;  %v4791_v15 = vld [vmem:[#allocation65_spill] sm:$0xff] }
 0x154   : > { %1998 = vmatpush.msra.mxu2 %v4784_v44  ;;  %2047 = vmatpush.msra.mxu3 %v4774_v22  ;;  %v4792_v44 = vld [vmem:[#allocation50_spill] sm:$0xff] }
 0x155   : > { %1842 = vmatpush.msra.mxu0 %v3256_v45  ;;  %1911 = vmatpush.msra.mxu1 %v4785_v58 }
 0x156   : > { %2001 = vmatpush.msra.mxu2 %v4786_v61  ;;  %2049 = vmatpush.msra.mxu3 %v4777_v0  ;;  %v4793_v61 = vld [vmem:[#allocation68_spill] sm:$0xff] }
 0x157   : > { %1844 = vmatpush.msra.mxu0 %v3269_v50  ;;  %1917 = vmatpush.msra.mxu1 %v4787_v41 }
 0x158   : > { %2004 = vmatpush.msra.mxu2 %v4788_v17  ;;  %2051 = vmatpush.msra.mxu3 %v3213_v28  ;;  %v946_v57 = vpop.f32.mrf.mxu1  ;;  %v1021_v2 = vpop.f32.mrf.mxu2  ;;  %v4794_v17 = vld [vmem:[#allocation54_spill] sm:$0xff] }
 0x159   : > { %1846 = vmatpush.msra.mxu0 %v3285_v56  ;;  %1923 = vmatpush.msra.mxu1 %v4789_v13  ;;  %v947_v25 = vadd.f32 %v946_v57, %v903_v39  ;;  %v4795_v57 = vld [vmem:[#allocation71_spill] sm:$0xff] }
 0x15a   : > { %2007 = vmatpush.msra.mxu2 %v4790_v7  ;;  %2053 = vmatpush.msra.mxu3 %v3230_v34  ;;  %v4797_v13 = vld [vmem:[#allocation27_spill] sm:$0xff] }
 0x15b   : > { %1848 = vmatpush.msra.mxu0 %v4666_v35  ;;  %1929 = vmatpush.msra.mxu1 %v4791_v15  ;;  %v1022_v23 = vadd.f32 %v1021_v2, %v947_v25  ;;  %v1062_v38 = vpop.f32.mrf.mxu3  ;;  %v4796_v2 = vld [vmem:[#allocation58_spill] sm:$0xff]  ;;  %v4798_v25 = vld [vmem:[#allocation73_spill] sm:$0xff] }
 0x15c   : > { %2010 = vmatpush.msra.mxu2 %v4792_v44  ;;  %2055 = vmatpush.msra.mxu3 %v3256_v45  ;;  %v907_v58 = vpop.f32.mrf.mxu0 }
 0x15d   : > { %1850 = vmatpush.msra.mxu0 %v4669_v59  ;;  %1935 = vmatpush.msra.mxu1 %v4793_v61  ;;  %v908_v39 = vadd.f32 %v907_v58, %v849_v18  ;;  %v4099_v41 = vadd.f32 %v1062_v38, %v1022_v23  ;;  %v4799_v18 = vld [vmem:[#allocation62_spill] sm:$0xff]  ;;  %v4800_v58 = vld [vmem:[#allocation28_spill] sm:$0xff]  ;;  %v4801_v61 = vld [vmem:[#allocation75_spill] sm:$0xff] }
 0x15e   : > { %2013 = vmatpush.msra.mxu2 %v4794_v17  ;;  %2057 = vmatpush.msra.mxu3 %v3269_v50  ;;  %v2823_v38 = vld [vmem:[%s3152_s27] sm:$0xff]  ;;  %v4802_v17 = vld [vmem:[#allocation63_spill] sm:$0xff] }
 0x15f   : > { %1852 = vmatpush.msra.mxu0 %v4671_v9  ;;  %1941 = vmatpush.msra.mxu1 %v4795_v57  ;;  %v1817_v44 = vmul.f32 %v2823_v38, %v2823_v38  ;;  %v4806_v38 = vld [vmem:[#allocation77_spill] sm:$0xff] }
 0x160   : > { %2016 = vmatpush.msra.mxu2 %v4796_v2  ;;  %2059 = vmatpush.msra.mxu3 %v3285_v56  ;;  %v4803_v2 = vld [vmem:[#allocation29_spill] sm:$0xff] }
 0x161   : > { %2082 = vmatpush.msrb.mxu0 %v4797_v13  ;;  %1947 = vmatpush.msra.mxu1 %v4798_v25  ;;  %v952_v7 = vpop.f32.mrf.mxu1  ;;  %v4804_v25 = vld [vmem:[#allocation79_spill] sm:$0xff] }
 0x162   : > { %2019 = vmatpush.msra.mxu2 %v4799_v18  ;;  %2061 = vmatpush.msra.mxu3 %v4666_v35  ;;  %v953_v15 = vadd.f32 %v952_v7, %v908_v39  ;;  %v1025_v23 = vpop.f32.mrf.mxu2  ;;  %v4122_v7 = vand.u32 4294901760, %v1817_v44  ;;  %v4805_v18 = vld [vmem:[#allocation31_spill] sm:$0xff] }
 0x163   : > { %2086 = vmatpush.msrb.mxu0 %v4800_v58  ;;  %1953 = vmatpush.msra.mxu1 %v4801_v61  ;;  %v4809_v58 = vld [vmem:[#allocation82_spill] sm:$0xff] }
 0x164   : > { %2022 = vmatpush.msra.mxu2 %v4802_v17  ;;  %2063 = vmatpush.msra.mxu3 %v4669_v59  ;;  %v1026_v57 = vadd.f32 %v1025_v23, %v953_v15  ;;  %v4807_v15 = vld [vmem:[#allocation81_spill] sm:$0xff]  ;;  %v4810_v61 = vld [vmem:[#allocation34_spill] sm:$0xff]  ;;  %v1854_v17 = vsub.f32 %v1817_v44, %v4122_v7  ;;  %v4815_v44 = vld [vmem:[#allocation91_spill] sm:$0xff] }
 0x165   : > { %2090 = vmatpush.msrb.mxu0 %v4803_v2  ;;  %v1066_v13 = vpop.f32.mrf.mxu3  ;;  %1959 = vmatpush.msra.mxu1 %v4804_v25  ;;  %v4808_v23 = vld [vmem:[#allocation33_spill] sm:$0xff]  ;;  %v4812_v2 = vld [vmem:[#allocation38_spill] sm:$0xff] }
 0x166   : > { %2194 = vmatpush.msrb.mxu2 %v3313_v8  ;;  %2065 = vmatpush.msra.mxu3 %v4671_v9  ;;  %v4120_v39 = vadd.f32 %v1066_v13, %v1026_v57  ;;  %v4811_v57 = vld [vmem:[#allocation85_spill] sm:$0xff]  ;;  %v2824_v13 = vld [vmem:[%s3152_s27 + $0x10] sm:$0xff] }
 0x167   : > { %2094 = vmatpush.msrb.mxu0 %v4805_v18  ;;  %1965 = vmatpush.msra.mxu1 %v4807_v15  ;;  %v1819_v25 = vmul.f32 %v2824_v13, %v2824_v13  ;;  %v4814_v18 = vld [vmem:[#allocation42_spill] sm:$0xff]  ;;  %v4822_v13 = vld [vmem:[#allocation57_spill] sm:$0xff] }
 0x168   : > { %2196 = vmatpush.msrb.mxu2 %v3331_v32  ;;  %2247 = vmatpush.msrb.mxu3 %v4806_v38  ;;  %v4816_v38 = vld [vmem:[#allocation45_spill] sm:$0xff] }
 0x169   : > { %2098 = vmatpush.msrb.mxu0 %v4808_v23  ;;  %2153 = vmatpush.msrb.mxu1 %v4679_v24  ;;  %v4813_v24 = vld [vmem:[#allocation88_spill] sm:$0xff]  ;;  %v4150_v15 = vand.u32 4294901760, %v1819_v25  ;;  %v4818_v23 = vld [vmem:[#allocation49_spill] sm:$0xff] }
 0x16a   : > { %2198 = vmatpush.msrb.mxu2 %v3350_v53  ;;  %2253 = vmatpush.msrb.mxu3 %v4809_v58  ;;  %v4819_v58 = vld [vmem:[#allocation97_spill] sm:$0xff] }
 0x16b   : > { %2102 = vmatpush.msrb.mxu0 %v4810_v61  ;;  %2155 = vmatpush.msrb.mxu1 %v4680_v60  ;;  %v1855_v60 = vand.u32 4294901760, %v1854_v17  ;;  %v4820_v61 = vld [vmem:[#allocation53_spill] sm:$0xff] }
 0x16c   : > { %2200 = vmatpush.msrb.mxu2 %v3372_v12  ;;  %2259 = vmatpush.msrb.mxu3 %v4811_v57  ;;  %v1862_v57 = vsub.f32 %v1819_v25, %v4150_v15 }
 0x16d   : > { %2106 = vmatpush.msrb.mxu0 %v4812_v2  ;;  %2157 = vmatpush.msrb.mxu1 %v4765_v19  ;;  %v4817_v19 = vld [vmem:[#allocation95_spill] sm:$0xff] }
 0x16e   : > { %2202 = vmatpush.msrb.mxu2 %v3400_v21  ;;  %2265 = vmatpush.msrb.mxu3 %v4813_v24  ;;  %v2825_v2 = vld [vmem:[%s3152_s27 + $0x8] sm:$0xff] }
 0x16f   : > { %2110 = vmatpush.msrb.mxu0 %v4814_v18  ;;  %2159 = vmatpush.msrb.mxu1 %v4683_v16  ;;  %v1856_v16 = vsub.f32 %v1854_v17, %v1855_v60  ;;  %v1818_v24 = vmul.f32 %v2825_v2, %v2825_v2  ;;  %v4845_v2 = vld [vmem:[#allocation108_spill] sm:$0xff] }
 0x170   : > { %2204 = vmatpush.msrb.mxu2 %v3419_v43  ;;  %2271 = vmatpush.msrb.mxu3 %v4815_v44 }
 0x171   : > { %2114 = vmatpush.msrb.mxu0 %v4816_v38  ;;  %2161 = vmatpush.msrb.mxu1 %v4768_v27  ;;  %v4821_v27 = vld [vmem:[#allocation100_spill] sm:$0xff]  ;;  %v4169_v25 = vand.u32 4294901760, %v1818_v24 }
 0x172   : > { %2206 = vmatpush.msrb.mxu2 %v3437_v37  ;;  %2277 = vmatpush.msrb.mxu3 %v4817_v19  ;;  %v4838_v19 = vld [vmem:[#allocation92_spill] sm:$0xff] }
 0x173   : > { %2118 = vmatpush.msrb.mxu0 %v4818_v23  ;;  %2163 = vmatpush.msrb.mxu1 %v4689_v10  ;;  %v1857_v10 = vand.u32 4294901760, %v1856_v16  ;;  %v4839_v16 = vld [vmem:[#allocation99_spill] sm:$0xff] }
 0x174   : > { %2208 = vmatpush.msrb.mxu2 %v3455_v14  ;;  %2283 = vmatpush.msrb.mxu3 %v4819_v58 }
 0x175   : > { %2122 = vmatpush.msrb.mxu0 %v4820_v61  ;;  %2165 = vmatpush.msrb.mxu1 %v4774_v22  ;;  %v1863_v22 = vand.u32 4294901760, %v1862_v57  ;;  %v4840_v61 = vld [vmem:[#allocation96_spill] sm:$0xff] }
 0x176   : > { %2210 = vmatpush.msrb.mxu2 %v3477_v47  ;;  %2289 = vmatpush.msrb.mxu3 %v4821_v27 }
 0x177   : > { %2126 = vmatpush.msrb.mxu0 %v4822_v13  ;;  %2167 = vmatpush.msrb.mxu1 %v4777_v0  ;;  %v4180_v0 = vsub.f32 %v1818_v24, %v4169_v25  ;;  %v4846_v24 = vld [vmem:[#allocation106_spill] sm:$0xff]  ;;  %v4848_v13 = vld [vmem:[#allocation109_spill] sm:$0xff] }
 0x178   : > { %2212 = vmatpush.msrb.mxu2 %v4678_v29  ;;  %2295 = vmatpush.msrb.mxu3 %v4741_v52  ;;  %v4823_v52 = vld [vmem:[#allocation107_spill] sm:$0xff] }
 0x179   : > { %2025 = vmatmul.f32.vlgmr.msra.gmra.mxu2 %v1854_v17  ;;  %2130 = vmatpush.msrb.mxu0 %v4742_v49  ;;  %v4824_v49 = vld [vmem:[#allocation69_spill] sm:$0xff]  ;;  %v2227_v18 = vand.u32 4294901760, %v4180_v0 }
 0x17a   : > { %2169 = vmatpush.msrb.mxu1 %v3213_v28  ;;  %2214 = vmatpush.msrb.mxu2 %v3512_v20  ;;  %v1864_v28 = vsub.f32 %v1862_v57, %v1863_v22 }
 0x17b   : > { %2301 = vmatpush.msrb.mxu3 %v4743_v11  ;;  %1858 = vmatmul.f32.vlgmr.msra.gmra.mxu0 %v1857_v10  ;;  %v4825_v11 = vld [vmem:[#allocation112_spill] sm:$0xff] }
 0x17c   : > { %2069 = vmatmul.f32.vlgmr.msra.gmra.mxu3 %v1855_v60  ;;  %2134 = vmatpush.msrb.mxu0 %v4744_v42  ;;  %v1865_v17 = vand.u32 4294901760, %v1864_v28 }
 0x17d   : > { %2171 = vmatpush.msrb.mxu1 %v3230_v34  ;;  %2216 = vmatpush.msrb.mxu2 %v3546_v33  ;;  %v4826_v34 = vld [vmem:[#allocation48_spill] sm:$0xff] }
 0x17e   : > { %2307 = vmatpush.msrb.mxu3 %v4823_v52  ;;  %1967 = vmatmul.f32.vlgmr.msra.gmra.mxu1 %v4122_v7  ;;  %v1820_v42 = vmul.f32 %v4826_v34, %v4826_v34 }
 0x17f   : > { %2138 = vmatpush.msrb.mxu0 %v4824_v49  ;;  %2173 = vmatpush.msrb.mxu1 %v3256_v45  ;;  %v4827_v45 = vld [vmem:[#allocation59_spill] sm:$0xff] }
 0x180   : > { %2218 = vmatpush.msrb.mxu2 %v3566_v62  ;;  %2313 = vmatpush.msrb.mxu3 %v4825_v11 }
 0x181   : > { %2142 = vmatpush.msrb.mxu0 %v3405_v30  ;;  %2175 = vmatpush.msrb.mxu1 %v3269_v50  ;;  %v4196_v50 = vand.u32 4294901760, %v1820_v42  ;;  %v2228_v30 = vsub.f32 %v4180_v0, %v2227_v18 }
 0x182   : > { %2220 = vmatpush.msrb.mxu2 %v3583_v5  ;;  %2319 = vmatpush.msrb.mxu3 %v4746_v40  ;;  %v4828_v40 = vld [vmem:[#allocation116_spill] sm:$0xff] }
 0x183   : > { %2349 = vmatpush.msra.mxu0 %v4827_v45  ;;  %2030 = vmatmul.f32.gmra.mxu2 %v1862_v57  ;;  %v4842_v57 = vld [vmem:[#allocation98_spill] sm:$0xff] }
 0x184   : > { %2177 = vmatpush.msrb.mxu1 %v3285_v56  ;;  %2222 = vmatpush.msrb.mxu2 %v3603_v3  ;;  %v4208_v56 = vsub.f32 %v1820_v42, %v4196_v50 }
 0x185   : > { %2325 = vmatpush.msrb.mxu3 %v4748_v1  ;;  %2352 = vmatpush.msra.mxu0 %v4749_v36  ;;  %v2229_v1 = vand.u32 4294901760, %v2228_v30 }
 0x186   : > { %1866 = vmatmul.f32.gmra.mxu0 %v1865_v17  ;;  %2075 = vmatmul.f32.gmra.mxu3 %v1863_v22 }
 0x187   : > { %2179 = vmatpush.msrb.mxu1 %v4666_v35  ;;  %2224 = vmatpush.msrb.mxu2 %v3629_v4  ;;  %v4829_v35 = vld [vmem:[#allocation72_spill] sm:$0xff] }
 0x188   : > { %2331 = vmatpush.msrb.mxu3 %v4828_v40  ;;  %2355 = vmatpush.msra.mxu0 %v3389_v6  ;;  %v2235_v6 = vand.u32 4294901760, %v4208_v56 }
 0x189   : > { %2454 = vmatpush.msra.mxu2 %v4750_v63  ;;  %1971 = vmatmul.f32.gmra.mxu1 %v4150_v15 }
 0x18a   : > { %2181 = vmatpush.msrb.mxu1 %v4669_v59  ;;  %2337 = vmatpush.msrb.mxu3 %v3703_v48  ;;  %v4830_v48 = vld [vmem:[#allocation76_spill] sm:$0xff] }
 0x18b   : > { %2358 = vmatpush.msra.mxu0 %v3411_v54  ;;  %2458 = vmatpush.msra.mxu2 %v4751_v51  ;;  %v4831_v54 = vld [vmem:[#allocation74_spill] sm:$0xff] }
 0x18c   : > { %2525 = vmatpush.msra.mxu3 %v3313_v8  ;;  %2183 = vmatpush.msrb.mxu1 %v4671_v9  ;;  %v4832_v9 = vld [vmem:[#allocation80_spill] sm:$0xff] }
 0x18d   : > { %2361 = vmatpush.msra.mxu0 %v3435_v26  ;;  %2462 = vmatpush.msra.mxu2 %v4829_v35 }
 0x18e   : > { %2407 = vmatpush.msra.mxu1 %v3313_v8  ;;  %2527 = vmatpush.msra.mxu3 %v3331_v32  ;;  %v2236_v8 = vsub.f32 %v4208_v56, %v2235_v6  ;;  %v1111_v26 = vpop.f32.mrf.mxu0 }
 0x18f   : > { %2230 = vmatmul.f32.vlgmr.msrb.gmra.mxu2 %v2229_v1  ;;  %2364 = vmatpush.msra.mxu0 %v4830_v48 }
 0x190   : > { %2409 = vmatpush.msra.mxu1 %v3331_v32  ;;  %2466 = vmatpush.msra.mxu2 %v4831_v54  ;;  %v2237_v51 = vand.u32 4294901760, %v2236_v8 }
 0x191   : > { %2529 = vmatpush.msra.mxu3 %v3350_v53  ;;  %2144 = vmatmul.f32.vlgmr.msrb.gmra.mxu0 %v4122_v7  ;;  %v1220_v59 = vpop.f32.mrf.mxu1 }
 0x192   : > { %2339 = vmatmul.f32.vlgmr.msrb.gmra.mxu3 %v4169_v25  ;;  %2367 = vmatpush.msra.mxu0 %v4832_v9  ;;  %v1221_v36 = vadd.f32 %v1220_v59, %v1111_v26  ;;  %v1278_v32 = vpop.f32.mrf.mxu2 }
 0x193   : > { %2411 = vmatpush.msra.mxu1 %v3350_v53  ;;  %2470 = vmatpush.msra.mxu2 %v3472_v55  ;;  %v4833_v53 = vld [vmem:[#allocation87_spill] sm:$0xff]  ;;  %v4834_v55 = vld [vmem:[#allocation86_spill] sm:$0xff] }
 0x194   : > { %2531 = vmatpush.msra.mxu3 %v3372_v12  ;;  %2185 = vmatmul.f32.vlgmr.msrb.gmra.mxu1 %v4122_v7  ;;  %v1279_v63 = vadd.f32 %v1278_v32, %v1221_v36 }
 0x195   : > { %2370 = vmatpush.msra.mxu0 %v3493_v31  ;;  %2413 = vmatpush.msra.mxu1 %v3372_v12  ;;  %v1322_v60 = vpop.f32.mrf.mxu3  ;;  %v4835_v31 = vld [vmem:[#allocation90_spill] sm:$0xff]  ;;  %v4836_v12 = vld [vmem:[#allocation89_spill] sm:$0xff] }
 0x196   : > { %2474 = vmatpush.msra.mxu2 %v4752_v46  ;;  %2533 = vmatpush.msra.mxu3 %v3400_v21  ;;  %v4239_v44 = vadd.f32 %v1322_v60, %v1279_v63 }
 0x197   : > { %2373 = vmatpush.msra.mxu0 %v4833_v53  ;;  %2415 = vmatpush.msra.mxu1 %v3400_v21  ;;  %v4837_v21 = vld [vmem:[#allocation93_spill] sm:$0xff] }
 0x198   : > { %2478 = vmatpush.msra.mxu2 %v4834_v55  ;;  %2535 = vmatpush.msra.mxu3 %v3419_v43  ;;  %v1119_v46 = vpop.f32.mrf.mxu0 }
 0x199   : > { %2238 = vmatmul.f32.gmra.mxu2 %v2237_v51  ;;  %2376 = vmatpush.msra.mxu0 %v4835_v31 }
 0x19a   : > { %2417 = vmatpush.msra.mxu1 %v3419_v43  ;;  %2482 = vmatpush.msra.mxu2 %v4836_v12 }
 0x19b   : > { %2537 = vmatpush.msra.mxu3 %v3437_v37  ;;  %2148 = vmatmul.f32.gmra.mxu0 %v4150_v15  ;;  %v1224_v7 = vpop.f32.mrf.mxu1 }
 0x19c   : > { %2343 = vmatmul.f32.gmra.mxu3 %v4196_v50  ;;  %2379 = vmatpush.msra.mxu0 %v4837_v21  ;;  %v1225_v38 = vadd.f32 %v1224_v7, %v1119_v46  ;;  %v1283_v23 = vpop.f32.mrf.mxu2 }
 0x19d   : > { %2419 = vmatpush.msra.mxu1 %v3437_v37  ;;  %2486 = vmatpush.msra.mxu2 %v4838_v19  ;;  %v4841_v37 = vld [vmem:[#allocation101_spill] sm:$0xff] }
 0x19e   : > { %2539 = vmatpush.msra.mxu3 %v3455_v14  ;;  %2189 = vmatmul.f32.gmra.mxu1 %v4150_v15  ;;  %v1284_v43 = vadd.f32 %v1283_v23, %v1225_v38  ;;  %v4843_v15 = vld [vmem:[#allocation104_spill] sm:$0xff] }
 0x19f   : > { %2382 = vmatpush.msra.mxu0 %v4839_v16  ;;  %2421 = vmatpush.msra.mxu1 %v3455_v14  ;;  %v1328_v58 = vpop.f32.mrf.mxu3  ;;  %v4844_v14 = vld [vmem:[#allocation103_spill] sm:$0xff] }
 0x1a0   : > { %2490 = vmatpush.msra.mxu2 %v4840_v61  ;;  %2541 = vmatpush.msra.mxu3 %v3477_v47  ;;  %v4260_v27 = vadd.f32 %v1328_v58, %v1284_v43 }
 0x1a1   : > { %2385 = vmatpush.msra.mxu0 %v4841_v37  ;;  %2423 = vmatpush.msra.mxu1 %v3477_v47  ;;  %v4847_v47 = vld [vmem:[#allocation110_spill] sm:$0xff] }
 0x1a2   : > { %2494 = vmatpush.msra.mxu2 %v4842_v57  ;;  %2543 = vmatpush.msra.mxu3 %v4678_v29 }
 0x1a3   : > { %2388 = vmatpush.msra.mxu0 %v4843_v15  ;;  %2425 = vmatpush.msra.mxu1 %v4678_v29  ;;  %v4849_v29 = vld [vmem:[#allocation111_spill] sm:$0xff] }
 0x1a4   : > { %2498 = vmatpush.msra.mxu2 %v4844_v14  ;;  %2545 = vmatpush.msra.mxu3 %v3512_v20 }
 0x1a5   : > { %2391 = vmatpush.msra.mxu0 %v4845_v2  ;;  %2427 = vmatpush.msra.mxu1 %v3512_v20  ;;  %v4850_v20 = vld [vmem:[#allocation114_spill] sm:$0xff] }
 0x1a6   : > { %2502 = vmatpush.msra.mxu2 %v4846_v24  ;;  %2547 = vmatpush.msra.mxu3 %v3546_v33 }
 0x1a7   : > { %2394 = vmatpush.msra.mxu0 %v4847_v47  ;;  %2429 = vmatpush.msra.mxu1 %v3546_v33  ;;  %v1483_v33 = vpop.f32.mrf.mxu2 }
 0x1a8   : > { %2506 = vmatpush.msra.mxu2 %v4848_v13  ;;  %2549 = vmatpush.msra.mxu3 %v3566_v62 }
 0x1a9   : > { %2397 = vmatmul.f32.vlgmr.msra.gmra.mxu0 %v4180_v0  ;;  %2431 = vmatpush.msra.mxu1 %v3566_v62  ;;  %v1592_v10 = vpop.f32.mrf.mxu3 }
 0x1aa   : > { %2510 = vmatpush.msra.mxu2 %v4849_v29  ;;  %2551 = vmatpush.msra.mxu3 %v3583_v5 }
 0x1ab   : > { %2433 = vmatpush.msra.mxu1 %v3583_v5  ;;  %v1397_v5 = vpop.f32.mrf.mxu0 }
 0x1ac   : > { %2514 = vmatpush.msra.mxu2 %v4850_v20  ;;  %2553 = vmatpush.msra.mxu3 %v3603_v3  ;;  %v1398_v59 = vadd.f32 %v1397_v5, %v4239_v44 }
 0x1ad   : > { %2516 = vmatmul.f32.vlgmr.msra.gmra.mxu2 %v4169_v25  ;;  %2435 = vmatpush.msra.mxu1 %v3603_v3  ;;  %v1438_v3 = vpop.f32.mrf.mxu1 }
 0x1ae   : > { %2555 = vmatpush.msra.mxu3 %v3629_v4  ;;  %v1439_v51 = vadd.f32 %v1438_v3, %v1398_v59 }
 0x1af   : > { %2557 = vmatmul.f32.vlgmr.msra.gmra.mxu3 %v4169_v25  ;;  %2437 = vmatpush.msra.mxu1 %v3629_v4 }
 0x1b0   : > { %2441 = vmatmul.f32.vlgmr.msra.gmra.mxu1 %v2227_v18  ;;  %v1484_v46 = vadd.f32 %v1483_v33, %v1439_v51 }
 0x1b1   : > { %2402 = vmatmul.f32.gmra.mxu0 %v4208_v56 }
 0x1b2   : > { %v1593_v23 = vadd.f32 %v1592_v10, %v1484_v46 }
 0x1b3   : > { %v1401_v62 = vpop.f32.mrf.mxu0 }
 0x1b4   : > { %v1402_v55 = vadd.f32 %v1401_v62, %v4260_v27 }
 0x1b5   : > { %2520 = vmatmul.f32.gmra.mxu2 %v4196_v50 }
 0x1b7   : > { %2561 = vmatmul.f32.gmra.mxu3 %v4196_v50 }
 0x1b8   : > { %2447 = vmatmul.f32.gmra.mxu1 %v2235_v6 }
 0x1b9   : > { %v1442_v22 = vpop.f32.mrf.mxu1 }
 0x1ba   : > { %v1491_v25 = vpop.f32.mrf.mxu2  ;;  %v1443_v7 = vadd.f32 %v1442_v22, %v1402_v55 }
 0x1bb   : > { %v1650_v52 = vpop.f32.mrf.mxu0 }
 0x1bc   : > { %v1651_v44 = vadd.f32 %v1650_v52, %v1593_v23  ;;  %v1492_v58 = vadd.f32 %v1491_v25, %v1443_v7 }
 0x1bd   : > { %v1596_v4 = vpop.f32.mrf.mxu3 }
 0x1be   : > { %v1597_v2 = vadd.f32 %v1596_v4, %v1492_v58 }
 0x1c4   : > { %v1694_v28 = vpop.f32.mrf.mxu1  ;;  %v1769_v49 = vpop.f32.mrf.mxu2 }
 0x1c5   : > { %v1695_v15 = vadd.f32 %v1694_v28, %v1651_v44 }
 0x1c7   : > { %v1810_v11 = vpop.f32.mrf.mxu3  ;;  %v1770_v13 = vadd.f32 %v1769_v49, %v1695_v15 }
 0x1c8   : > { %v1655_v0 = vpop.f32.mrf.mxu0 }
 0x1c9   : > { %v1656_v20 = vadd.f32 %v1655_v0, %v1597_v2  ;;  %v1811_v10 = vadd.f32 %v1810_v11, %v1770_v13 }
 0x1cd   : > { %v1700_v34 = vpop.f32.mrf.mxu1 }
 0x1ce   : > { %v1773_v17 = vpop.f32.mrf.mxu2  ;;  %v1701_v22 = vadd.f32 %v1700_v34, %v1656_v20 }
 0x1d0   : > { %v1774_v28 = vadd.f32 %v1773_v17, %v1701_v22 }
 0x1d1   : > { %v4297_v45 = vpop.f32.mrf.mxu3 }
 0x1d2   : > { %v1815_v49 = vadd.f32 %v4297_v45, %v1774_v28  ;;  %v2817_v45 = vld [vmem:[%s4347_s3] ss:$0 sm:$0xff] }
 0x1f8   : > { %v1859_v42 = vpop.f32.mrf.mxu0 }
 0x1fb   : > { %v1968_v18 = vpop.f32.mrf.mxu1 }
 0x1fc   : > { %v2026_v50 = vpop.f32.mrf.mxu2  ;;  %v1969_v1 = vadd.f32 %v1968_v18, %v1859_v42 }
 0x1fe   : > { %v2027_v48 = vadd.f32 %v2026_v50, %v1969_v1 }
 0x1ff   : > { %v2070_v40 = vpop.f32.mrf.mxu3 }
 0x200   : > { %v2071_v8 = vadd.f32 %v2070_v40, %v2027_v48 }
 0x203   : > { %v1867_v30 = vpop.f32.mrf.mxu0 }
 0x206   : > { %v1972_v56 = vpop.f32.mrf.mxu1  ;;  %v2031_v6 = vpop.f32.mrf.mxu2 }
 0x207   : > { %v1973_v26 = vadd.f32 %v1972_v56, %v1867_v30 }
 0x209   : > { %v2076_v54 = vpop.f32.mrf.mxu3  ;;  %v2032_v36 = vadd.f32 %v2031_v6, %v1973_v26 }
 0x20b   : > { %v2077_v31 = vadd.f32 %v2076_v54, %v2032_v36 }
 0x20e   : > { %v2145_v35 = vpop.f32.mrf.mxu0 }
 0x20f   : > { %v2146_v32 = vadd.f32 %v2145_v35, %v2071_v8 }
 0x211   : > { %v2186_v9 = vpop.f32.mrf.mxu1 }
 0x212   : > { %v2231_v63 = vpop.f32.mrf.mxu2  ;;  %v2187_v12 = vadd.f32 %v2186_v9, %v2146_v32  ;;  %v2818_v32 = vld [vmem:[%s4347_s3 + $0x1] ss:$0 sm:$0xff] }
 0x214   : > { %v2232_v38 = vadd.f32 %v2231_v63, %v2187_v12 }
 0x215   : > { %v2340_v53 = vpop.f32.mrf.mxu3 }
 0x216   : > { %v2341_v61 = vadd.f32 %v2340_v53, %v2232_v38 }
 0x218   : > { %v2149_v60 = vpop.f32.mrf.mxu0 }
 0x219   : > { %v2150_v19 = vadd.f32 %v2149_v60, %v2077_v31 }
 0x21b   : > { %v2190_v21 = vpop.f32.mrf.mxu1 }
 0x21c   : > { %v2239_v16 = vpop.f32.mrf.mxu2  ;;  %v2191_v37 = vadd.f32 %v2190_v21, %v2150_v19 }
 0x21e   : > { %v2240_v27 = vadd.f32 %v2239_v16, %v2191_v37 }
 0x21f   : > { %v2344_v57 = vpop.f32.mrf.mxu3 }
 0x220   : > { %v2345_v33 = vadd.f32 %v2344_v57, %v2240_v27 }
 0x226   : > { %v2398_v43 = vpop.f32.mrf.mxu0 }
 0x227   : > { %v2399_v14 = vadd.f32 %v2398_v43, %v2341_v61 }
 0x22d   : > { %v2442_v24 = vpop.f32.mrf.mxu1 }
 0x22e   : > { %v2443_v47 = vadd.f32 %v2442_v24, %v2399_v14  ;;  %v2403_v5 = vpop.f32.mrf.mxu0 }
 0x22f   : > { %v2404_v25 = vadd.f32 %v2403_v5, %v2345_v33 }
 0x230   : > { %v2517_v29 = vpop.f32.mrf.mxu2 }
 0x231   : > { %v2518_v3 = vadd.f32 %v2517_v29, %v2443_v47 }
 0x232   : > { %v2558_v62 = vpop.f32.mrf.mxu3 }
 0x233   : > { %v2559_v52 = vadd.f32 %v2558_v62, %v2518_v3 }
 0x235   : > { %v2565_v42 = vmul.f32 %v2559_v52, %v1811_v10  ;;  %v2448_v18 = vpop.f32.mrf.mxu1 }
 0x236   : > { %v2449_v50 = vadd.f32 %v2448_v18, %v2404_v25 }
 0x237   : > { %v2567_v30 = vmax.f32 %v2565_v42, 1e-12 }
 0x238   : > { %v2521_v4 = vpop.f32.mrf.mxu2 }
 0x239   : > { %2819 = vrsqrt.f32 %v2567_v30  ;;  %v2522_v40 = vadd.f32 %v2521_v4, %v2449_v50  ;;  %vm2575_vm1 = vweird.f32 %v2567_v30 }
 0x23a   : > { %v2562_v56 = vpop.f32.mrf.mxu3 }
 0x23b   : > { %v2563_v0 = vadd.f32 %v2562_v56, %v2522_v40 }
 0x23d   : > { %v2566_v1 = vmul.f32 %v2563_v0, %v1815_v49 }
 0x23f   : > { %v2820_v6 = vpop.eup %2819  ;;  %v2568_v35 = vmax.f32 %v2566_v1, 1e-12 }
 0x240   : > { %v2570_v48 = vmul.f32 %v2820_v6, %v2567_v30  ;;  %vm2576_vm0 = vweird.f32 %v2820_v6 }
 0x241   : > { %2821 = vrsqrt.f32 %v2568_v35  ;;  %vm2577_vm2 = vmor %vm2575_vm1, %vm2576_vm0  ;;  %vm2585_vm4 = vweird.f32 %v2568_v35 }
 0x242   : > { %v2571_v11 = vmul.f32 %v2820_v6, %v2570_v48 }
 0x244   : > { %v2572_v34 = vmul.f32 0.5, %v2571_v11 }
 0x246   : > { %v2573_v54 = vsub.f32 1.5, %v2572_v34 }
 0x247   : > { %v2822_v17 = vpop.eup %2821 }
 0x248   : > { %v2574_v8 = vmul.f32 %v2820_v6, %v2573_v54  ;;  %v2580_v26 = vmul.f32 %v2822_v17, %v2568_v35  ;;  %vm2586_vm3 = vweird.f32 %v2822_v17 }
 0x249   : > { %vm2587_vm5 = vmor %vm2585_vm4, %vm2586_vm3 }
 0x24a   : > { %v2578_v59 = vsel %vm2577_vm2, %v2820_v6, %v2574_v8  ;;  %v2581_v9 = vmul.f32 %v2822_v17, %v2580_v26 }
 0x24b   : > { %v2589_v36 = vmul.f32 %v2578_v59, %v4099_v41 }
 0x24c   : > { %v2582_v63 = vmul.f32 0.5, %v2581_v9 }
 0x24d   : > { %v2593_v51 = vmul.f32 %v2817_v45, %v2589_v36 }
 0x24e   : > { %v2583_v60 = vsub.f32 1.5, %v2582_v63 }
 0x24f   : > { %v2597_v53 = vadd.f32 %v2818_v32, %v2593_v51 }
 0x250   : > { %v2584_v55 = vmul.f32 %v2822_v17, %v2583_v60 }
 0x251   : > { %2599 = vst [vmem:[%s277_s24] sm:$0xff] %v2597_v53 }
 0x252   : > { %v2588_v41 = vsel %vm2587_vm5, %v2822_v17, %v2584_v55 }
 0x253   : > { %v2590_v31 = vmul.f32 %v2588_v41, %v4120_v39 }
 0x255   : > { %v2594_v12 = vmul.f32 %v2817_v45, %v2590_v31 }
 0x257   : > { %v2598_v46 = vadd.f32 %v2818_v32, %v2594_v12 }
 0x259   : > { %2600 = vst [vmem:[%s277_s24 + $0x8] sm:$0xff] %v2598_v46 }
 0x25a   : > { %2943 = shalt.err (!%p2940_p11)
}
 0x25b   : > { %s2997_s8 = smov 128   ;;  %s2998_s21 = smov 8  }
 0x25c   : > { %2757 = dma.vmem_to_hbm [thread:$0]  (%p3091_p7), %s2615_s28, 256, %s2617_s23, %s2602_s19, %s2997_s8, %s2997_s8, %s2998_s21  }
 0x25d PF: > { %s2631_s10 = sand.u32 1, %s2978_s15   ;;  %p4851_p12 = scmp.ge.s32.totalorder %s2990_s18, 2 }
 0x25e   : > { %s2632_s11 = scalar_lea.sflag [#allocation4], %s2631_s10 }
 0x25f   : > { %p2771_p13 = pnand %p4851_p12, %p3059_p6 }
 0x261   : > { %p2772_p0 = pneg %p2771_p13 }
 0x263   : > { %2973 = dma.done.wait (%p2772_p0), %s2632_s11, 256  }
 0x264   : > { %2975 = vsyncadd (%p2772_p0), %s2632_s11, 4294967040  ;;  %s4852_s30 = sld [smem:[#allocation13_spill]]  ;;  %p20_p3 = scmp.ge.s32.totalorder %s3077_s29, 4  }
 0x265   : > { %s4853_s15 = smov %s2982_s16  ;;  %s4854_s16 = smov %s2986_s17 }
 0x266   : > { %s4856_s18 = smov %s3077_s29  ;;  %22 = sbr.rel (!%p20_p3) target bundleno = 10 (0xa), region = 98 }
 0x26a   : > { %s4855_s17 = smov %s4852_s30 }
 0x26b   :  { %2638 = vsyncpa [#allocation3], 1 }
 0x26c   :  { %2640 = vsyncpa [#allocation3 + $0x1], 1 }
 0x26d   :  { %2641 = vsyncpa [#allocation6], 1 }
 0x26e   :  { %2643 = vsyncpa [#allocation6 + $0x1], 1 }
 0x26f   :  { %2644 = vsyncpa [#allocation4], 1 }
 0x270   :  { %2646 = vsyncpa [#allocation4 + $0x1], 1 }

</bundles_post_ra>
